<compile_context>
chip_gen: v6e
topology: v6e:2x2x1
jax: 0.10.0
libtpu: 0.0.40
codegen_flags: <defaults>
</compile_context>

<pallas_src>
import jax
import jax.numpy as jnp
from jax.experimental import pallas as pl
from jax.experimental.pallas import tpu as pltpu


# --------------------------------------------------------------------------- #
# Kernel
# --------------------------------------------------------------------------- #
def _encoder_kernel(a_ref, x_ref, w1_ref, b1_ref, w2_ref, b2_ref,
                    wp_ref, bp_ref, node_ref, emb_ref):
    """One grid step == a tile of `bt` dense graphs (fixed N nodes each).

    Per graph (Hp = lane-padded hidden width, padded columns are exact zeros):
        H1 = relu((A @ X) @ W1 + b1)      # layer-1 reassociated (F < H)
        H2 = relu(A @ (H1 @ W2) + b2)     # node_rep
        g  = mean_nodes(H2)
        e  = l2norm(g @ Wp + bp)          # graph embedding (fused epilogue)
    """
    bt, n, _ = a_ref.shape
    f = x_ref.shape[-1]
    hp = w1_ref.shape[-1]

    # f32 in HBM, cast to bf16 after load (VPU cast, hidden under MXU work)
    # so the MXU runs at bf16 rate with f32 accumulation.
    a = a_ref[...].astype(jnp.bfloat16)                       # (bt, N, N)
    x = x_ref[...].astype(jnp.bfloat16)                       # (bt, N, F)

    # ---- GCN layer 1 (reassociated): relu((A @ X) @ W1 + b1) -------------- #
    ax = jnp.einsum('bnm,bmf->bnf', a, x,
                    preferred_element_type=jnp.float32)       # (bt, N, F) f32
    ax = ax.astype(jnp.bfloat16).reshape(bt * n, f)           # stacked across graphs
    h1 = jnp.dot(ax, w1_ref[...], preferred_element_type=jnp.float32)
    h1 = jnp.maximum(h1 + b1_ref[...], 0.0)                   # (bt*N, Hp) f32

    # ---- GCN layer 2: relu(A @ (H1 @ W2) + b2) -> node_rep ---------------- #
    hw = jnp.dot(h1.astype(jnp.bfloat16), w2_ref[...],
                 preferred_element_type=jnp.float32)          # (bt*N, Hp) f32
    hw = hw.astype(jnp.bfloat16).reshape(bt, n, hp)
    h2 = jnp.einsum('bnm,bmh->bnh', a, hw,
                    preferred_element_type=jnp.float32)       # (bt, N, Hp) f32
    h2 = jnp.maximum(h2.reshape(bt * n, hp) + b2_ref[...], 0.0)

    node_ref[...] = h2.astype(node_ref.dtype)                 # lane-dense store

    # ---- fused epilogue: mean pool + graph_proj + L2 normalize ------------ #
    pool = jnp.mean(h2.reshape(bt, n, hp), axis=1)            # (bt, Hp) f32, XLU
    p = jnp.dot(pool, wp_ref[...],
                preferred_element_type=jnp.float32) + bp_ref[...]   # (bt, E) f32
    sq = jnp.sum(p * p, axis=-1, keepdims=True)
    inv = jax.lax.rsqrt(jnp.maximum(sq, 1e-24))   # == 1 / max(||p||, 1e-12), EUP
    emb_ref[...] = (p * inv).reshape(bt, 1, -1).astype(emb_ref.dtype)


# --------------------------------------------------------------------------- #
# Wrapper
# --------------------------------------------------------------------------- #
def _pick_graphs_per_step(B, N, F, Hp, *, min_steps=4, vmem_budget=20 * 2**20):
    """Largest divisor of B keeping grid >= min_steps (>=2 steps per v7x TC)
    and the double-buffered per-step DMA footprint inside a VMEM budget."""
    best = 1
    for bt in range(1, B + 1):
        if B % bt:
            continue
        if B // bt < min(min_steps, B):
            continue
        per_graph = N * N * 4 + N * F * 4 + N * Hp * 2   # A + X in (f32), node out (bf16)
        if 2 * bt * per_graph > vmem_budget:             # x2 for double buffering
            continue
        best = max(best, bt)
    return best


def net_encoder_infer(a_hat, x, params, *, node_dtype=jnp.bfloat16):
    """Net_Encoder 'infer' forward for a batch of dense graphs.

    a_hat : (B, N, N) symmetric-normalized adjacency (f32)
    x     : (B, N, F) node features (f32)
    Returns (node_rep (B, N, H) [node_dtype], graph_embeds (B, E) [f32]).
    """
    B, N, F = x.shape
    H = params["w1"].shape[1]
    E = params["wp"].shape[1]

    # Lane-pad the hidden width to a multiple of 128 so every H-wide vreg and
    # node_rep store is lane-dense. Padded weight columns/rows are zero, so all
    # real outputs are mathematically unchanged.
    Hp = max(128, ((H + 127) // 128) * 128)
    pad_h = Hp - H

    w1 = jnp.pad(params["w1"], ((0, 0), (0, pad_h))).astype(jnp.bfloat16)   # (F, Hp)
    b1 = jnp.pad(params["b1"], ((0, 0), (0, pad_h)))                        # (1, Hp) f32
    w2 = jnp.pad(params["w2"], ((0, pad_h), (0, pad_h))).astype(jnp.bfloat16)  # (Hp, Hp)
    b2 = jnp.pad(params["b2"], ((0, 0), (0, pad_h)))                        # (1, Hp) f32
    wp = jnp.pad(params["wp"], ((0, pad_h), (0, 0)))                        # (Hp, E) f32
    bp = params["bp"]                                                       # (1, E)  f32

    bt = _pick_graphs_per_step(B, N, F, Hp)
    grid = (B // bt,)

    full2 = lambda shape: pl.BlockSpec(shape, lambda g: (0, 0))

    node_flat, emb3 = pl.pallas_call(
        _encoder_kernel,
        out_shape=(
            jax.ShapeDtypeStruct((B * N, Hp), node_dtype),   # node_rep slab (lane-dense)
            jax.ShapeDtypeStruct((B, 1, E), jnp.float32),    # graph embeddings
        ),
        grid_spec=pltpu.PrefetchScalarGridSpec(
            num_scalar_prefetch=0,
            grid=grid,
            in_specs=[
                pl.BlockSpec((bt, N, N), lambda g: (g, 0, 0)),   # A_hat tile (f32)
                pl.BlockSpec((bt, N, F), lambda g: (g, 0, 0)),   # X tile (f32)
                full2((F, Hp)),                                  # W1 (bf16)
                full2((1, Hp)),                                  # b1 (f32)
                full2((Hp, Hp)),                                 # W2 (bf16)
                full2((1, Hp)),                                  # b2 (f32)
                full2((Hp, E)),                                  # Wp (f32)
                full2((1, E)),                                   # bp (f32)
            ],
            out_specs=[
                pl.BlockSpec((bt * N, Hp), lambda g: (g, 0)),
                pl.BlockSpec((bt, 1, E), lambda g: (g, 0, 0)),
            ],
        ),
        compiler_params=pltpu.CompilerParams(
            dimension_semantics=("parallel",),
            vmem_limit_bytes=32 * 1024 * 1024,
        ),
    )(a_hat, x, w1, b1, w2, b2, wp, bp)

    node_rep = node_flat.reshape(B, N, Hp)
    if Hp != H:
        node_rep = node_rep[..., :H]
    embeds = emb3.reshape(B, E)
    return node_rep, embeds


# --------------------------------------------------------------------------- #
# Synthetic data / params
# --------------------------------------------------------------------------- #
def _normalized_adjacency(key, B, N):
    """Random symmetric graph -> A_hat = D^-1/2 (A + I) D^-1/2 (dense GCN form)."""
    raw = jax.random.uniform(key, (B, N, N))
    adj = (raw < 0.05).astype(jnp.float32)
    adj = jnp.maximum(adj, jnp.swapaxes(adj, -1, -2))           # symmetrize
    adj = adj + jnp.eye(N, dtype=jnp.float32)[None]             # self-loops
    deg = jnp.sum(adj, axis=-1)
    d_inv_sqrt = 1.0 / jnp.sqrt(jnp.maximum(deg, 1.0))
    return adj * d_inv_sqrt[:, :, None] * d_inv_sqrt[:, None, :]


def init_params(key, feat_dim, gnn_hidden, embed_dim):
    ks = jax.random.split(key, 3)
    s = lambda fan_in: 1.0 / jnp.sqrt(jnp.float32(fan_in))
    return {
        "w1": jax.random.normal(ks[0], (feat_dim, gnn_hidden), jnp.float32) * s(feat_dim),
        "b1": jnp.zeros((1, gnn_hidden), jnp.float32),
        "w2": jax.random.normal(ks[1], (gnn_hidden, gnn_hidden), jnp.float32) * s(gnn_hidden),
        "b2": jnp.zeros((1, gnn_hidden), jnp.float32),
        "wp": jax.random.normal(ks[2], (gnn_hidden, embed_dim), jnp.float32) * s(gnn_hidden),
        "bp": jnp.zeros((1, embed_dim), jnp.float32),
    }


def _reference(a_hat, x, params):
    """Plain-JAX reference with the same reassociation and bf16 rounding points."""
    a = a_hat.astype(jnp.bfloat16)
    xb = x.astype(jnp.bfloat16)
    w1 = params["w1"].astype(jnp.bfloat16)
    w2 = params["w2"].astype(jnp.bfloat16)
    ax = jnp.einsum('bnm,bmf->bnf', a, xb,
                    preferred_element_type=jnp.float32).astype(jnp.bfloat16)
    h1 = jnp.maximum(jnp.einsum('bnf,fh->bnh', ax, w1,
                                preferred_element_type=jnp.float32) + params["b1"], 0.0)
    hw = jnp.einsum('bnh,hk->bnk', h1.astype(jnp.bfloat16), w2,
                    preferred_element_type=jnp.float32).astype(jnp.bfloat16)
    h2 = jnp.maximum(jnp.einsum('bnm,bmh->bnh', a, hw,
                                preferred_element_type=jnp.float32) + params["b2"], 0.0)
    g = jnp.mean(h2, axis=1)
    p = g @ params["wp"] + params["bp"]
    e = p / jnp.maximum(jnp.linalg.norm(p, axis=-1, keepdims=True), 1e-12)
    return h2, e


# --------------------------------------------------------------------------- #
# Demo
# --------------------------------------------------------------------------- #
if __name__ == "__main__":
    # batch of 8 dense graphs, 128 nodes, feat=32, gnn hidden=64, embed=32
    B, N, FEAT, HID, EMB = 8, 128, 32, 64, 32

    key = jax.random.PRNGKey(0)
    k_adj, k_x, k_p = jax.random.split(key, 3)

    a_hat = _normalized_adjacency(k_adj, B, N)
    x = jax.random.normal(k_x, (B, N, FEAT), jnp.float32)
    params = init_params(k_p, FEAT, HID, EMB)

    node_rep, embeds = net_encoder_infer(a_hat, x, params)
    jax.block_until_ready((node_rep, embeds))

    assert node_rep.shape == (B, N, HID)
    assert embeds.shape == (B, EMB)

    # embeddings should be unit-norm (F.normalize semantics)
    norms = jnp.linalg.norm(embeds, axis=-1)
    assert bool(jnp.all(jnp.abs(norms - 1.0) < 1e-3))

    # cross-check against a plain-JAX reference with matching rounding points
    ref_node, ref_emb = _reference(a_hat, x, params)
    assert bool(jnp.allclose(node_rep.astype(jnp.float32), ref_node,
                             atol=2e-2, rtol=2e-2))
    assert bool(jnp.allclose(embeds, ref_emb, atol=1e-2, rtol=1e-2))

    print("KERNEL_OK")
</pallas_src>

<mosaic_0001>
module attributes {stable_mosaic.version = 11 : i64} {
  func.func @_encoder_kernel(%arg0: i32, %arg1: memref<2x128x128xf32, #tpu.memory_space<vmem>>, %arg2: memref<2x128x32xf32, #tpu.memory_space<vmem>>, %arg3: memref<32x128xbf16, #tpu.memory_space<vmem>>, %arg4: memref<1x128xf32, #tpu.memory_space<vmem>>, %arg5: memref<128x128xbf16, #tpu.memory_space<vmem>>, %arg6: memref<1x128xf32, #tpu.memory_space<vmem>>, %arg7: memref<128x32xf32, #tpu.memory_space<vmem>>, %arg8: memref<1x32xf32, #tpu.memory_space<vmem>>, %arg9: memref<256x128xbf16, #tpu.memory_space<vmem>>, %arg10: memref<2x1x32xf32, #tpu.memory_space<vmem>>) attributes {dimension_semantics = [#tpu.dimension_semantics<parallel>], iteration_bounds = array<i64: 4>, scalar_prefetch = 0 : i64, scratch_operands = 0 : i64, tpu.core_type = #tpu.core_type<tc>, window_params = [{transform_indices = @transform_0, window_bounds = array<i64: 2, 128, 128>}, {transform_indices = @transform_1, window_bounds = array<i64: 2, 128, 32>}, {pipeline_mode = #tpu.pipeline_mode<synchronous>, transform_indices = @transform_2, window_bounds = array<i64: 32, 128>}, {pipeline_mode = #tpu.pipeline_mode<synchronous>, transform_indices = @transform_3, window_bounds = array<i64: 1, 128>}, {pipeline_mode = #tpu.pipeline_mode<synchronous>, transform_indices = @transform_4, window_bounds = array<i64: 128, 128>}, {pipeline_mode = #tpu.pipeline_mode<synchronous>, transform_indices = @transform_5, window_bounds = array<i64: 1, 128>}, {pipeline_mode = #tpu.pipeline_mode<synchronous>, transform_indices = @transform_6, window_bounds = array<i64: 128, 32>}, {pipeline_mode = #tpu.pipeline_mode<synchronous>, transform_indices = @transform_7, window_bounds = array<i64: 1, 32>}, {transform_indices = @transform_8, window_bounds = array<i64: 256, 128>}, {transform_indices = @transform_9, window_bounds = array<i64: 2, 1, 32>}]} {
    %c0 = arith.constant 0 : index
    %c0_0 = arith.constant 0 : index
    %c0_1 = arith.constant 0 : index
    %0 = vector.load %arg1[%c0, %c0_0, %c0_1] : memref<2x128x128xf32, #tpu.memory_space<vmem>>, vector<2x128x128xf32>
    %1 = arith.truncf %0 : vector<2x128x128xf32> to vector<2x128x128xbf16>
    %c0_2 = arith.constant 0 : index
    %c0_3 = arith.constant 0 : index
    %c0_4 = arith.constant 0 : index
    %2 = vector.load %arg2[%c0_2, %c0_3, %c0_4] : memref<2x128x32xf32, #tpu.memory_space<vmem>>, vector<2x128x32xf32>
    %3 = arith.truncf %2 : vector<2x128x32xf32> to vector<2x128x32xbf16>
    "tpu.trace_start"() <{level = 10 : i32, message = "bnm,bmf->bnf"}> : () -> ()
    %cst = arith.constant dense<0.000000e+00> : vector<2x128x32xf32>
    %4 = tpu.matmul %1, %3, %cst {dimension_numbers = #tpu.dot_dimension_numbers<[2], [1], [1], [2], [0, 0, 0, 1, 1, 2], [0], [0]>} : vector<2x128x128xbf16>, vector<2x128x32xbf16>, vector<2x128x32xf32> -> vector<2x128x32xf32>
    "tpu.trace_stop"() : () -> ()
    %5 = arith.truncf %4 : vector<2x128x32xf32> to vector<2x128x32xbf16>
    %6 = vector.shape_cast %5 : vector<2x128x32xbf16> to vector<256x32xbf16>
    %c0_5 = arith.constant 0 : index
    %c0_6 = arith.constant 0 : index
    %7 = vector.load %arg3[%c0_5, %c0_6] : memref<32x128xbf16, #tpu.memory_space<vmem>>, vector<32x128xbf16>
    %cst_7 = arith.constant dense<0.000000e+00> : vector<256x128xf32>
    %8 = tpu.matmul %6, %7, %cst_7 {dimension_numbers = #tpu.dot_dimension_numbers<[1], [0], [0], [1], [0, 0, 1, 1], [], []>} : vector<256x32xbf16>, vector<32x128xbf16>, vector<256x128xf32> -> vector<256x128xf32>
    %c0_8 = arith.constant 0 : index
    %c0_9 = arith.constant 0 : index
    %9 = vector.load %arg4[%c0_8, %c0_9] : memref<1x128xf32, #tpu.memory_space<vmem>>, vector<1x128xf32>
    %10 = vector.broadcast %9 : vector<1x128xf32> to vector<256x128xf32>
    %11 = arith.addf %8, %10 : vector<256x128xf32>
    %cst_10 = arith.constant 0.000000e+00 : f32
    %12 = vector.broadcast %cst_10 : f32 to vector<256x128xf32>
    %13 = arith.maximumf %11, %12 : vector<256x128xf32>
    %14 = arith.truncf %13 : vector<256x128xf32> to vector<256x128xbf16>
    %c0_11 = arith.constant 0 : index
    %c0_12 = arith.constant 0 : index
    %15 = vector.load %arg5[%c0_11, %c0_12] : memref<128x128xbf16, #tpu.memory_space<vmem>>, vector<128x128xbf16>
    %cst_13 = arith.constant dense<0.000000e+00> : vector<256x128xf32>
    %16 = tpu.matmul %14, %15, %cst_13 {dimension_numbers = #tpu.dot_dimension_numbers<[1], [0], [0], [1], [0, 0, 1, 1], [], []>} : vector<256x128xbf16>, vector<128x128xbf16>, vector<256x128xf32> -> vector<256x128xf32>
    %17 = arith.truncf %16 : vector<256x128xf32> to vector<256x128xbf16>
    %18 = vector.shape_cast %17 : vector<256x128xbf16> to vector<2x128x128xbf16>
    "tpu.trace_start"() <{level = 10 : i32, message = "bnm,bmh->bnh"}> : () -> ()
    %cst_14 = arith.constant dense<0.000000e+00> : vector<2x128x128xf32>
    %19 = tpu.matmul %1, %18, %cst_14 {dimension_numbers = #tpu.dot_dimension_numbers<[2], [1], [1], [2], [0, 0, 0, 1, 1, 2], [0], [0]>} : vector<2x128x128xbf16>, vector<2x128x128xbf16>, vector<2x128x128xf32> -> vector<2x128x128xf32>
    "tpu.trace_stop"() : () -> ()
    %20 = vector.shape_cast %19 : vector<2x128x128xf32> to vector<256x128xf32>
    %c0_15 = arith.constant 0 : index
    %c0_16 = arith.constant 0 : index
    %21 = vector.load %arg6[%c0_15, %c0_16] : memref<1x128xf32, #tpu.memory_space<vmem>>, vector<1x128xf32>
    %22 = vector.broadcast %21 : vector<1x128xf32> to vector<256x128xf32>
    %23 = arith.addf %20, %22 : vector<256x128xf32>
    %cst_17 = arith.constant 0.000000e+00 : f32
    %24 = vector.broadcast %cst_17 : f32 to vector<256x128xf32>
    %25 = arith.maximumf %23, %24 : vector<256x128xf32>
    %26 = arith.truncf %25 : vector<256x128xf32> to vector<256x128xbf16>
    %c0_18 = arith.constant 0 : index
    %c0_19 = arith.constant 0 : index
    %27 = vector.load %arg9[%c0_18, %c0_19] : memref<256x128xbf16, #tpu.memory_space<vmem>>, vector<256x128xbf16>
    tpu.vector_store %arg9[%c0_18, %c0_19], %26 {strides = array<i32>} : memref<256x128xbf16, #tpu.memory_space<vmem>>, vector<256x128xbf16>,
    %28 = vector.shape_cast %25 : vector<256x128xf32> to vector<2x128x128xf32>
    %cst_20 = arith.constant dense<0.000000e+00> : vector<2x128xf32>
    %29 = vector.multi_reduction <add>, %28, %cst_20 [1] : vector<2x128x128xf32> to vector<2x128xf32>
    %cst_21 = arith.constant 1.280000e+02 : f32
    %30 = vector.broadcast %cst_21 : f32 to vector<2x128xf32>
    %31 = arith.divf %29, %30 : vector<2x128xf32>
    %c0_22 = arith.constant 0 : index
    %c0_23 = arith.constant 0 : index
    %32 = vector.load %arg7[%c0_22, %c0_23] : memref<128x32xf32, #tpu.memory_space<vmem>>, vector<128x32xf32>
    %cst_24 = arith.constant dense<0.000000e+00> : vector<2x32xf32>
    %33 = tpu.matmul %31, %32, %cst_24 {dimension_numbers = #tpu.dot_dimension_numbers<[1], [0], [0], [1], [0, 0, 1, 1], [], []>} : vector<2x128xf32>, vector<128x32xf32>, vector<2x32xf32> -> vector<2x32xf32>
    %c0_25 = arith.constant 0 : index
    %c0_26 = arith.constant 0 : index
    %34 = vector.load %arg8[%c0_25, %c0_26] : memref<1x32xf32, #tpu.memory_space<vmem>>, vector<1x32xf32>
    %35 = vector.broadcast %34 : vector<1x32xf32> to vector<2x32xf32>
    %36 = arith.addf %33, %35 : vector<2x32xf32>
    %37 = arith.mulf %36, %36 : vector<2x32xf32>
    %cst_27 = arith.constant dense<0.000000e+00> : vector<2xf32>
    %38 = vector.multi_reduction <add>, %37, %cst_27 [1] : vector<2x32xf32> to vector<2xf32>
    %39 = vector.shape_cast %38 : vector<2xf32> to vector<2x1xf32>
    %cst_28 = arith.constant 1.000000e-24 : f32
    %40 = vector.broadcast %cst_28 : f32 to vector<2x1xf32>
    %41 = arith.maximumf %39, %40 : vector<2x1xf32>
    %42 = math.rsqrt %41 : vector<2x1xf32>
    %43 = vector.broadcast %42 : vector<2x1xf32> to vector<2x32xf32>
    %44 = arith.mulf %36, %43 : vector<2x32xf32>
    %45 = vector.shape_cast %44 : vector<2x32xf32> to vector<2x1x32xf32>
    %c0_29 = arith.constant 0 : index
    %c0_30 = arith.constant 0 : index
    %c0_31 = arith.constant 0 : index
    %46 = vector.load %arg10[%c0_29, %c0_30, %c0_31] : memref<2x1x32xf32, #tpu.memory_space<vmem>>, vector<2x1x32xf32>
    tpu.vector_store %arg10[%c0_29, %c0_30, %c0_31], %45 {strides = array<i32>} : memref<2x1x32xf32, #tpu.memory_space<vmem>>, vector<2x1x32xf32>,
    return
  }
  func.func @transform_0(%arg0: i32) -> (i32, i32, i32) {
    %c0_i32 = arith.constant 0 : i32
    %c0_i32_0 = arith.constant 0 : i32
    %c0_i32_1 = arith.constant 0 : i32
    return %arg0, %c0_i32, %c0_i32_0 : i32, i32, i32
  }
  func.func @transform_1(%arg0: i32) -> (i32, i32, i32) {
    %c0_i32 = arith.constant 0 : i32
    %c0_i32_0 = arith.constant 0 : i32
    %c0_i32_1 = arith.constant 0 : i32
    return %arg0, %c0_i32, %c0_i32_0 : i32, i32, i32
  }
  func.func @transform_2(%arg0: i32) -> (i32, i32) {
    %c0_i32 = arith.constant 0 : i32
    %c0_i32_0 = arith.constant 0 : i32
    %c0_i32_1 = arith.constant 0 : i32
    return %c0_i32, %c0_i32_0 : i32, i32
  }
  func.func @transform_3(%arg0: i32) -> (i32, i32) {
    %c0_i32 = arith.constant 0 : i32
    %c0_i32_0 = arith.constant 0 : i32
    %c0_i32_1 = arith.constant 0 : i32
    return %c0_i32, %c0_i32_0 : i32, i32
  }
  func.func @transform_4(%arg0: i32) -> (i32, i32) {
    %c0_i32 = arith.constant 0 : i32
    %c0_i32_0 = arith.constant 0 : i32
    %c0_i32_1 = arith.constant 0 : i32
    return %c0_i32, %c0_i32_0 : i32, i32
  }
  func.func @transform_5(%arg0: i32) -> (i32, i32) {
    %c0_i32 = arith.constant 0 : i32
    %c0_i32_0 = arith.constant 0 : i32
    %c0_i32_1 = arith.constant 0 : i32
    return %c0_i32, %c0_i32_0 : i32, i32
  }
  func.func @transform_6(%arg0: i32) -> (i32, i32) {
    %c0_i32 = arith.constant 0 : i32
    %c0_i32_0 = arith.constant 0 : i32
    %c0_i32_1 = arith.constant 0 : i32
    return %c0_i32, %c0_i32_0 : i32, i32
  }
  func.func @transform_7(%arg0: i32) -> (i32, i32) {
    %c0_i32 = arith.constant 0 : i32
    %c0_i32_0 = arith.constant 0 : i32
    %c0_i32_1 = arith.constant 0 : i32
    return %c0_i32, %c0_i32_0 : i32, i32
  }
  func.func @transform_8(%arg0: i32) -> (i32, i32) {
    %c0_i32 = arith.constant 0 : i32
    %c0_i32_0 = arith.constant 0 : i32
    return %arg0, %c0_i32 : i32, i32
  }
  func.func @transform_9(%arg0: i32) -> (i32, i32, i32) {
    %c0_i32 = arith.constant 0 : i32
    %c0_i32_0 = arith.constant 0 : i32
    %c0_i32_1 = arith.constant 0 : i32
    return %arg0, %c0_i32, %c0_i32_0 : i32, i32, i32
  }
}

</mosaic_0001>

<bundles_post_ra>
// kernel: tpu_custom_call.1
= control target key start
LH: loop header
LB: loop body
LE: loop exit
PB: predicated region body
PF: predicated region fallthrough
CT: control target
= control target key end

     0   :  { %15 = vsyncpa [#allocation3], 0  ;;  %s3215_s0 = inlined_call_operand.vmem [shape: f32[8,128,128], index: 0, kind: input, shape index: {}]   ;;  %s3216_s1 = inlined_call_operand.vmem [shape: f32[8,128,32], index: 1, kind: input, shape index: {}]   ;;  %s3217_s2 = inlined_call_operand.vmem [shape: bf16[32,128], index: 2, kind: input, shape index: {}]   ;;  %s3218_s3 = inlined_call_operand.vmem [shape: f32[1,128], index: 3, kind: input, shape index: {}]   ;;  %s3219_s4 = inlined_call_operand.vmem [shape: bf16[128,128], index: 4, kind: input, shape index: {}]   ;;  %s3220_s5 = inlined_call_operand.vmem [shape: f32[1,128], index: 5, kind: input, shape index: {}]   ;;  %s3221_s6 = inlined_call_operand.vmem [shape: f32[128,32], index: 6, kind: input, shape index: {}]   ;;  %s3222_s7 = inlined_call_operand.vmem [shape: f32[1,32], index: 7, kind: input, shape index: {}]   ;;  %s3223_s8 = inlined_call_operand.hbm [shape: bf16[1024,128], index: 8, kind: output, shape index: {0}]   ;;  %s3224_s9 = inlined_call_operand.hbm [shape: f32[8,1,32], index: 9, kind: output, shape index: {1}]  }
   0x1   :  { %17 = vsyncpa [#allocation3 + $0x1], 0 }
   0x2   :  { %18 = vsyncpa [#allocation5], 0 }
   0x3   :  { %20 = vsyncpa [#allocation5 + $0x1], 0  ;;  %s2744_s30 = smov 0   ;;  %s2746_s10 = smov 0  }
   0x4   :  { %s2748_s11 = smov 0   ;;  %s2750_s12 = smov 0  }
   0x5 LB: > { %s2765_s13 = sadd.s32 4294967295, %s2683_s12   ;;  %s1948_s14 = sadd.s32 4294967294, %s2683_s12   ;;  %s2683_s12 = sphi %s2750_s12, %s3231_s12   ;;  %s2679_s11 = sphi %s2748_s11, %s3230_s11   ;;  %s2675_s10 = sphi %s2746_s10, %s3229_s10   ;;  %s2671_s30 = sphi %s2744_s30, %s3228_s30  }
   0x6   : > { %s2769_s15 = sadd.s32 1, %s2683_s12   ;;  %s211_s16 = sadd.s32 1, %s2679_s11 }
   0x7   : > { %s208_s17 = ssub.s32 %s2683_s12, %s2769_s15  ;;  %p221_p0 = scmp.ne.s32.totalorder %s2679_s11, %s2675_s10 }
   0x8   : > { %p209_p1 = scmp.eq.s32.totalorder %s208_s17, 0  ;;  %p222_p2 = scmp.eq.s32.totalorder %s2765_s13, 3 }
   0x9   : > { %p227_p3 = scmp.ne.s32.totalorder %s2675_s10, %s2671_s30  ;;  %p228_p4 = scmp.eq.s32.totalorder %s1948_s14, 3 }
   0xa   : > { %s2780_s18 = scalar_select %p209_p1, %s2679_s11, %s211_s16  }
   0xb   : > { %p2782_p5 = por %p222_p2, %p221_p0  ;;  %p2786_p6 = por %p228_p4, %p227_p3 }
   0xc   : > { %p1951_p7 = scmp.ge.s32.totalorder %s2683_s12, 1  ;;  %p310_p8 = scmp.lt.s32.totalorder %s2683_s12, 5 }
   0xe   : > { %p311_p9 = pnand %p1951_p7, %p310_p8 }
   0xf   : > { %s1954_s21 = sshll.u32 (!%p311_p9), %s2765_s13, 1  ;;  %s2063_s14 = sshll.u32 (!%p311_p9), %s2765_s13, 11 }
  0x10   : > { %314 = sbr.rel (%p311_p9) target bundleno = 1376 (0x560), region = 52  ;;  %p359_p10 = scmp.lt.s32.totalorder (!%p311_p9), %s1954_s21, 7 }
  0x15   : > { %s3233_s21 = smov (!%p359_p10, %s1954_s21), 7  ;;  %vm704_vm0 = vcmask 261120   ;;  %vm2686_vm1 = vmmov 0   ;;  %vm1698_vm2 = vcmask 1041409   ;;  %vm1772_vm3 = vcmask 254976  }
  0x16   : > { %s2029_s22 = sshll.u32 %s3233_s21, 7 }
  0x17   : > { %s2796_s25 = scalar_lea.vmem %s3216_s1, %s2029_s22  ;;  %s2807_s28 = scalar_lea.vmem %s3215_s0, %s2029_s22 }
  0x18   : > { %v437_v0 = vld [vmem:[%s2796_s25 + $0x70] sm:$0xff]  ;;  %v438_v1 = vld [vmem:[%s2796_s25 + $0x78] sm:$0xff]  ;;  %v435_v2 = vld [vmem:[%s2796_s25 + $0x60] sm:$0xff]  ;;  %s3139_s22 = scalar_lea.hbm %s3223_s8, %s2063_s14 }
  0x19   : > { %v462_v3 = vpack.c.bf16 %v438_v1, %v437_v0  ;;  %v436_v4 = vld [vmem:[%s2796_s25 + $0x68] sm:$0xff]  ;;  %v433_v6 = vld [vmem:[%s2796_s25 + $0x50] sm:$0xff]  ;;  %v434_v7 = vld [vmem:[%s2796_s25 + $0x58] sm:$0xff] }
  0x1a   : > { %v461_v5 = vpack.c.bf16 %v436_v4, %v435_v2  ;;  %v453_v8 = vld [vmem:[%s2796_s25 + $0xf0] sm:$0xff]  ;;  %v460_v9 = vpack.c.bf16 %v434_v7, %v433_v6  ;;  %v431_v10 = vld [vmem:[%s2796_s25 + $0x40] sm:$0xff]  ;;  %v432_v11 = vld [vmem:[%s2796_s25 + $0x48] sm:$0xff] }
  0x1b   : > { %2283 = vmatprep.subr.bf16.mxu0 %v462_v3  ;;  %v454_v12 = vld [vmem:[%s2796_s25 + $0xf8] sm:$0xff]  ;;  %v451_v14 = vld [vmem:[%s2796_s25 + $0xe0] sm:$0xff]  ;;  %v452_v15 = vld [vmem:[%s2796_s25 + $0xe8] sm:$0xff]  ;;  %v459_v22 = vpack.c.bf16 %v432_v11, %v431_v10 }
  0x1c   : > { %2284 = vmatpush3.bf16.msra.mxu0 %v462_v3  ;;  %v470_v13 = vpack.c.bf16 %v454_v12, %v453_v8  ;;  %v375_v16 = vld [vmem:[%s2807_s28] sm:$0xff]  ;;  %v469_v17 = vpack.c.bf16 %v452_v15, %v451_v14  ;;  %v376_v18 = vld [vmem:[%s2807_s28 + $0x8] sm:$0xff]  ;;  %v449_v20 = vld [vmem:[%s2796_s25 + $0xd0] sm:$0xff] }
  0x1d   : > { %2285 = vmatprep.subr.bf16.mxu0 %v461_v5  ;;  %v2817_v19 = vpack.c.bf16 %v376_v18, %v375_v16  ;;  %v450_v21 = vld [vmem:[%s2796_s25 + $0xd8] sm:$0xff]  ;;  %v429_v23 = vld [vmem:[%s2796_s25 + $0x30] sm:$0xff]  ;;  %v447_v26 = vld [vmem:[%s2796_s25 + $0xc0] sm:$0xff] }
  0x1e   : > { %2315 = vmatprep.subr.bf16.mxu1 %v470_v13  ;;  %v430_v24 = vld [vmem:[%s2796_s25 + $0x38] sm:$0xff]  ;;  %v468_v25 = vpack.c.bf16 %v450_v21, %v449_v20  ;;  %v448_v27 = vld [vmem:[%s2796_s25 + $0xc8] sm:$0xff]  ;;  %v427_v29 = vld [vmem:[%s2796_s25 + $0x20] sm:$0xff] }
  0x1f   : > { %2316 = vmatpush3.bf16.msra.mxu1 %v470_v13  ;;  %2299 = vmatprep.mubr.bf16.mxu0 %v2817_v19  ;;  %v458_v28 = vpack.c.bf16 %v430_v24, %v429_v23  ;;  %v428_v30 = vld [vmem:[%s2796_s25 + $0x28] sm:$0xff]  ;;  %v467_v31 = vpack.c.bf16 %v448_v27, %v447_v26  ;;  %v445_v32 = vld [vmem:[%s2796_s25 + $0xb0] sm:$0xff]  ;;  %v446_v33 = vld [vmem:[%s2796_s25 + $0xb8] sm:$0xff] }
  0x20   : > { %2286 = vmatpush3.bf16.msra.mxu0 %v461_v5  ;;  %2317 = vmatprep.subr.bf16.mxu1 %v469_v17  ;;  %v391_v34 = vld [vmem:[%s2807_s28 + $0x80] sm:$0xff]  ;;  %v392_v35 = vld [vmem:[%s2807_s28 + $0x88] sm:$0xff]  ;;  %v457_v36 = vpack.c.bf16 %v428_v30, %v427_v29  ;;  %v425_v38 = vld [vmem:[%s2796_s25 + $0x10] sm:$0xff]  ;;  %v466_v40 = vpack.c.bf16 %v446_v33, %v445_v32 }
  0x21   : > { %2287 = vmatprep.subr.bf16.mxu0 %v460_v9  ;;  %v2832_v37 = vpack.c.bf16 %v392_v35, %v391_v34  ;;  %v426_v39 = vld [vmem:[%s2796_s25 + $0x18] sm:$0xff]  ;;  %v443_v41 = vld [vmem:[%s2796_s25 + $0xa0] sm:$0xff]  ;;  %v444_v42 = vld [vmem:[%s2796_s25 + $0xa8] sm:$0xff] }
  0x22   : > { %v456_v43 = vpack.c.bf16 %v426_v39, %v425_v38  ;;  %v423_v44 = vld [vmem:[%s2796_s25] sm:$0xff]  ;;  %v424_v45 = vld [vmem:[%s2796_s25 + $0x8] sm:$0xff]  ;;  %v465_v46 = vpack.c.bf16 %v444_v42, %v443_v41  ;;  %v441_v47 = vld [vmem:[%s2796_s25 + $0x90] sm:$0xff] }
  0x23   : > { %2318 = vmatpush3.bf16.msra.mxu1 %v469_v17  ;;  %2331 = vmatprep.mubr.bf16.mxu1 %v2832_v37  ;;  %v442_v48 = vld [vmem:[%s2796_s25 + $0x98] sm:$0xff]  ;;  %v455_v49 = vpack.c.bf16 %v424_v45, %v423_v44  ;;  %v439_v51 = vld [vmem:[%s2796_s25 + $0x80] sm:$0xff]  ;;  %v440_v52 = vld [vmem:[%s2796_s25 + $0x88] sm:$0xff]  ;;  %s3068_s25 = sand.u32 1, %s2675_s10  }
  0x24   : > { %2288 = vmatpush3.bf16.msra.mxu0 %v460_v9  ;;  %2319 = vmatprep.subr.bf16.mxu1 %v468_v25  ;;  %v464_v50 = vpack.c.bf16 %v442_v48, %v441_v47  ;;  %v377_v53 = vld [vmem:[%s2807_s28 + $0x10] sm:$0xff]  ;;  %v378_v54 = vld [vmem:[%s2807_s28 + $0x18] sm:$0xff]  ;;  %v379_v55 = vld [vmem:[%s2807_s28 + $0x20] sm:$0xff]  ;;  %v463_v57 = vpack.c.bf16 %v440_v52, %v439_v51  ;;  %s1952_s26 = sshll.u32 %s3068_s25, 7 }
  0x25   : > { %2289 = vmatprep.subr.bf16.mxu0 %v459_v22  ;;  %v380_v56 = vld [vmem:[%s2807_s28 + $0x28] sm:$0xff]  ;;  %v2849_v58 = vpack.c.bf16 %v378_v54, %v377_v53  ;;  %v393_v60 = vld [vmem:[%s2807_s28 + $0x90] sm:$0xff]  ;;  %v394_v61 = vld [vmem:[%s2807_s28 + $0x98] sm:$0xff]  ;;  %s3075_s27 = scalar_lea.vmem [#allocation2], %s1952_s26  ;;  %s2687_s26 = smov [#allocation2]  }
  0x26   : > { %v2851_v59 = vpack.c.bf16 %v380_v56, %v379_v55  ;;  %v395_v62 = vld [vmem:[%s2807_s28 + $0xa0] sm:$0xff]  ;;  %v396_v63 = vld [vmem:[%s2807_s28 + $0xa8] sm:$0xff]  ;;  %v381_v0 = vld [vmem:[%s2807_s28 + $0x30] sm:$0xff]  ;;  %v2861_v2 = vpack.c.bf16 %v394_v61, %v393_v60  ;;  %s1826_s16 = sshll.u32 %s3075_s27, 4  ;;  %s3141_s16 = int_to_ptr.vmem [resolvable:$true] %s1826_s16 }
  0x27   : > { %2320 = vmatpush3.bf16.msra.mxu1 %v468_v25  ;;  %v382_v1 = vld [vmem:[%s2807_s28 + $0x38] sm:$0xff]  ;;  %v383_v3 = vld [vmem:[%s2807_s28 + $0x40] sm:$0xff]  ;;  %v384_v4 = vld [vmem:[%s2807_s28 + $0x48] sm:$0xff]  ;;  %v2865_v5 = vpack.c.bf16 %v396_v63, %v395_v62  ;;  %s2593_s24 = scalar_lea.vmem %s3141_s16, 2048 }
  0x28   : > { %2290 = vmatpush3.bf16.msra.mxu0 %v459_v22  ;;  %2321 = vmatprep.subr.bf16.mxu1 %v467_v31  ;;  %v2867_v6 = vpack.c.bf16 %v382_v1, %v381_v0  ;;  %v2869_v7 = vpack.c.bf16 %v384_v4, %v383_v3  ;;  %v397_v8 = vld [vmem:[%s2807_s28 + $0xb0] sm:$0xff]  ;;  %v398_v9 = vld [vmem:[%s2807_s28 + $0xb8] sm:$0xff]  ;;  %v399_v10 = vld [vmem:[%s2807_s28 + $0xc0] sm:$0xff]  ;;  %p2594_p11 = scmp.ne.s32.totalorder %s3141_s16, %s2593_s24 }
  0x29   : > { %2291 = vmatprep.subr.bf16.mxu0 %v458_v28  ;;  %v400_v11 = vld [vmem:[%s2807_s28 + $0xc8] sm:$0xff]  ;;  %v385_v12 = vld [vmem:[%s2807_s28 + $0x50] sm:$0xff]  ;;  %v386_v13 = vld [vmem:[%s2807_s28 + $0x58] sm:$0xff]  ;;  %v2881_v14 = vpack.c.bf16 %v398_v9, %v397_v8 }
  0x2a   : > { %v387_v15 = vld [vmem:[%s2807_s28 + $0x60] sm:$0xff]  ;;  %v388_v16 = vld [vmem:[%s2807_s28 + $0x68] sm:$0xff]  ;;  %v2885_v17 = vpack.c.bf16 %v400_v11, %v399_v10  ;;  %v2887_v18 = vpack.c.bf16 %v386_v13, %v385_v12  ;;  %v401_v21 = vld [vmem:[%s2807_s28 + $0xd0] sm:$0xff]  ;;  %p2595_p12 = pnand %p2594_p11, %p2782_p5 }
  0x2b   : > { %2322 = vmatpush3.bf16.msra.mxu1 %v467_v31  ;;  %v2889_v20 = vpack.c.bf16 %v388_v16, %v387_v15  ;;  %v402_v22 = vld [vmem:[%s2807_s28 + $0xd8] sm:$0xff]  ;;  %v403_v23 = vld [vmem:[%s2807_s28 + $0xe0] sm:$0xff]  ;;  %v404_v24 = vld [vmem:[%s2807_s28 + $0xe8] sm:$0xff] }
  0x2c   : > { %2292 = vmatpush3.bf16.msra.mxu0 %v458_v28  ;;  %2323 = vmatprep.subr.bf16.mxu1 %v466_v40  ;;  %v389_v25 = vld [vmem:[%s2807_s28 + $0x70] sm:$0xff]  ;;  %v390_v26 = vld [vmem:[%s2807_s28 + $0x78] sm:$0xff]  ;;  %v2901_v27 = vpack.c.bf16 %v402_v22, %v401_v21  ;;  %v2903_v28 = vpack.c.bf16 %v404_v24, %v403_v23  ;;  %v2581_v33 = vld [vmem:[%s3217_s2 + $0x8] sm:$0xff]   ;;  %p2596_p13 = pneg %p2595_p12 }
  0x2d   : > { %2293 = vmatprep.subr.bf16.mxu0 %v457_v36  ;;  %v2905_v29 = vpack.c.bf16 %v390_v26, %v389_v25  ;;  %v405_v30 = vld [vmem:[%s2807_s28 + $0xf0] sm:$0xff]  ;;  %v406_v31 = vld [vmem:[%s2807_s28 + $0xf8] sm:$0xff]  ;;  %v2582_v34 = vld [vmem:[%s3217_s2] sm:$0xff]   ;;  %s2597_s28 = sshll.u32 %s2687_s26, 4  ;;  %s2598_s28 = int_to_ptr.vmem [resolvable:$false] %s2597_s28 }
  0x2e   : > { %v2912_v32 = vpack.c.bf16 %v406_v31, %v405_v30  ;;  %v2583_v35 = vld [vmem:[%s3219_s4 + $0x38] sm:$0xff]   ;;  %v2585_v38 = vld [vmem:[%s3219_s4 + $0x28] sm:$0xff]   ;;  %v2586_v39 = vld [vmem:[%s3219_s4 + $0x20] sm:$0xff]   ;;  %p2600_p0 = scmp.lt.s32.totalorder %s3141_s16, %s2598_s28 }
  0x2f   : > { %2324 = vmatpush3.bf16.msra.mxu1 %v466_v40  ;;  %v2587_v40 = vld [vmem:[%s3219_s4 + $0x18] sm:$0xff]  }
  0x30   : > { %2294 = vmatpush3.bf16.msra.mxu0 %v457_v36  ;;  %2325 = vmatprep.subr.bf16.mxu1 %v465_v46  ;;  %v2584_v36 = vld [vmem:[%s3219_s4 + $0x30] sm:$0xff]  }
  0x31   : > { %2295 = vmatprep.subr.bf16.mxu0 %v456_v43 }
  0x33   : > { %2326 = vmatpush3.bf16.msra.mxu1 %v465_v46 }
  0x34   : > { %2296 = vmatpush3.bf16.msra.mxu0 %v456_v43  ;;  %2327 = vmatprep.subr.bf16.mxu1 %v464_v50 }
  0x35   : > { %2297 = vmatprep.subr.bf16.mxu0 %v455_v49 }
  0x37   : > { %2328 = vmatpush3.bf16.msra.mxu1 %v464_v50 }
  0x38   : > { %2298 = vmatpush3.bf16.msra.mxu0 %v455_v49  ;;  %2329 = vmatprep.subr.bf16.mxu1 %v463_v57 }
  0x39   : > { %2347 = vmatprep.subr.bf16.mxu0 %v2581_v33 }
  0x3b   : > { %2300 = vmatmul.mubr.bf16.vlgmr.msra.gmra.mxu0 %v2849_v58  ;;  %2330 = vmatpush3.bf16.msra.mxu1 %v463_v57 }
  0x3c   : > { %2303 = vmatprep.mubr.bf16.mxu0 %v2851_v59  ;;  %2348 = vmatpush3.bf16.msra.mxu0 %v2581_v33 }
  0x3d   : > { %2349 = vmatprep.subr.bf16.mxu0 %v2582_v34  ;;  %2383 = vmatprep.subr.bf16.mxu1 %v2583_v35 }
  0x3e   : > { %2332 = vmatmul.mubr.bf16.vlgmr.msra.gmra.mxu1 %v2861_v2 }
  0x3f   : > { %2335 = vmatprep.mubr.bf16.mxu1 %v2865_v5  ;;  %2384 = vmatpush3.bf16.msra.mxu1 %v2583_v35 }
  0x40   : > { %2350 = vmatpush3.bf16.msra.mxu0 %v2582_v34  ;;  %2385 = vmatprep.subr.bf16.mxu1 %v2584_v36 }
  0x43   : > { %2304 = vmatmul.mubr.bf16.gmra.mxu0 %v2867_v6  ;;  %2386 = vmatpush3.bf16.msra.mxu1 %v2584_v36 }
  0x44   : > { %2307 = vmatprep.mubr.bf16.mxu0 %v2869_v7  ;;  %2387 = vmatprep.subr.bf16.mxu1 %v2585_v38 }
  0x46   : > { %2336 = vmatmul.mubr.bf16.gmra.mxu1 %v2881_v14 }
  0x47   : > { %2339 = vmatprep.mubr.bf16.mxu1 %v2885_v17  ;;  %2388 = vmatpush3.bf16.msra.mxu1 %v2585_v38 }
  0x48   : > { %2389 = vmatprep.subr.bf16.mxu1 %v2586_v39 }
  0x4b   : > { %2308 = vmatmul.mubr.bf16.gmra.mxu0 %v2887_v18  ;;  %2390 = vmatpush3.bf16.msra.mxu1 %v2586_v39 }
  0x4c   : > { %2311 = vmatprep.mubr.bf16.mxu0 %v2889_v20  ;;  %2391 = vmatprep.subr.bf16.mxu1 %v2587_v40 }
  0x4e   : > { %2340 = vmatmul.mubr.bf16.gmra.mxu1 %v2901_v27 }
  0x4f   : > { %2343 = vmatprep.mubr.bf16.mxu1 %v2903_v28  ;;  %2392 = vmatpush3.bf16.msra.mxu1 %v2587_v40 }
  0x53   : > { %2312 = vmatmul.mubr.bf16.gmra.mxu0 %v2905_v29 }
  0x56   : > { %2344 = vmatmul.mubr.bf16.gmra.mxu1 %v2912_v32 }
  0xfb   : > { %v2301_v41 = vpop.f32.mrf.mxu0 }
  0xfd   : > { %v505_v42 = vpop.f32.mrf.mxu0 }
  0xfe   : > { %v2333_v44 = vpop.f32.mrf.mxu1 }
  0xff   : > { %v2302_v43 = vpop.f32.mrf.mxu0 }
 0x100   : > { %v602_v47 = vpop.f32.mrf.mxu1  ;;  %v666_v48 = vpack.c.bf16 %v2302_v43, %v2301_v41  ;;  %v2588_v41 = vld [vmem:[%s3219_s4 + $0x10] sm:$0xff]   ;;  %v2590_v43 = vld [vmem:[%s3219_s4] sm:$0xff]  }
 0x101   : > { %v508_v45 = vpop.f32.mrf.mxu0  ;;  %2393 = vmatprep.subr.bf16.mxu1 %v2588_v41 }
 0x102   : > { %v665_v46 = vpack.c.bf16 %v508_v45, %v505_v42  ;;  %v2334_v50 = vpop.f32.mrf.mxu1  ;;  %2394 = vmatpush3.bf16.msra.mxu1 %v2588_v41  ;;  %v2589_v42 = vld [vmem:[%s3219_s4 + $0x8] sm:$0xff]   ;;  %v2965_v45 = vld [vmem:[%s3218_s3] ss:$0 sm:$0xff] }
 0x103   : > { %v2305_v49 = vpop.f32.mrf.mxu0  ;;  %v674_v26 = vpack.c.bf16 %v2334_v50, %v2333_v44  ;;  %2395 = vmatprep.subr.bf16.mxu1 %v2589_v42 }
 0x104   : > { %2351 = vmatprep.mubr.msk.bf16.mxu0 %vm704_vm0, %v665_v46  ;;  %v605_v52 = vpop.f32.mrf.mxu1 }
 0x105   : > { %v521_v51 = vpop.f32.mrf.mxu0  ;;  %2352 = vmatmul.mubr.msk.bf16.vlgmr.msra.gmra.mxu0 %vm704_vm0, %v666_v48  ;;  %v673_v21 = vpack.c.bf16 %v605_v52, %v602_v47 }
 0x106   : > { %v2337_v54 = vpop.f32.mrf.mxu1  ;;  %2396 = vmatpush3.bf16.msra.mxu1 %v2589_v42 }
 0x107   : > { %v2306_v53 = vpop.f32.mrf.mxu0  ;;  %2397 = vmatprep.subr.bf16.mxu1 %v2590_v43 }
 0x108   : > { %v618_v57 = vpop.f32.mrf.mxu1  ;;  %v668_v60 = vpack.c.bf16 %v2306_v53, %v2305_v49 }
 0x109   : > { %v524_v55 = vpop.f32.mrf.mxu0 }
 0x10a   : > { %v667_v56 = vpack.c.bf16 %v524_v55, %v521_v51  ;;  %v2338_v62 = vpop.f32.mrf.mxu1  ;;  %2398 = vmatpush3.bf16.msra.mxu1 %v2590_v43 }
 0x10b   : > { %v2309_v61 = vpop.f32.mrf.mxu0  ;;  %v676_v34 = vpack.c.bf16 %v2338_v62, %v2337_v54 }
 0x10c   : > { %2355 = vmatprep.mubr.msk.bf16.mxu0 %vm704_vm0, %v667_v56  ;;  %v621_v1 = vpop.f32.mrf.mxu1 }
 0x10d   : > { %v537_v63 = vpop.f32.mrf.mxu0  ;;  %2356 = vmatmul.mubr.msk.bf16.gmra.mxu0 %vm704_vm0, %v668_v60  ;;  %v675_v25 = vpack.c.bf16 %v621_v1, %v618_v57 }
 0x10e   : > { %v2341_v10 = vpop.f32.mrf.mxu1 }
 0x10f   : > { %v2310_v0 = vpop.f32.mrf.mxu0 }
 0x110   : > { %v670_v8 = vpack.c.bf16 %v2310_v0, %v2309_v61  ;;  %v634_v13 = vpop.f32.mrf.mxu1 }
 0x111   : > { %v540_v3 = vpop.f32.mrf.mxu0 }
 0x112   : > { %v669_v4 = vpack.c.bf16 %v540_v3, %v537_v63  ;;  %v2342_v23 = vpop.f32.mrf.mxu1 }
 0x113   : > { %v2313_v9 = vpop.f32.mrf.mxu0  ;;  %v678_v39 = vpack.c.bf16 %v2342_v23, %v2341_v10 }
 0x114   : > { %2359 = vmatprep.mubr.msk.bf16.mxu0 %vm704_vm0, %v669_v4  ;;  %v637_v24 = vpop.f32.mrf.mxu1 }
 0x115   : > { %v553_v11 = vpop.f32.mrf.mxu0  ;;  %2360 = vmatmul.mubr.msk.bf16.gmra.mxu0 %vm704_vm0, %v670_v8  ;;  %v677_v33 = vpack.c.bf16 %v637_v24, %v634_v13 }
 0x116   : > { %v2345_v30 = vpop.f32.mrf.mxu1 }
 0x117   : > { %v2314_v12 = vpop.f32.mrf.mxu0 }
 0x118   : > { %v672_v22 = vpack.c.bf16 %v2314_v12, %v2313_v9  ;;  %v650_v31 = vpop.f32.mrf.mxu1 }
 0x119   : > { %v556_v15 = vpop.f32.mrf.mxu0 }
 0x11a   : > { %v671_v16 = vpack.c.bf16 %v556_v15, %v553_v11  ;;  %v2346_v35 = vpop.f32.mrf.mxu1 }
 0x11b   : > { %v680_v40 = vpack.c.bf16 %v2346_v35, %v2345_v30 }
 0x11c   : > { %2363 = vmatprep.mubr.msk.bf16.mxu0 %vm704_vm0, %v671_v16  ;;  %v653_v36 = vpop.f32.mrf.mxu1 }
 0x11d   : > { %2364 = vmatmul.mubr.msk.bf16.gmra.mxu0 %vm704_vm0, %v672_v22  ;;  %v679_v38 = vpack.c.bf16 %v653_v36, %v650_v31 }
 0x11e   : > { %2367 = vmatprep.mubr.msk.bf16.mxu0 %vm704_vm0, %v673_v21 }
 0x125   : > { %2368 = vmatmul.mubr.msk.bf16.gmra.mxu0 %vm704_vm0, %v674_v26 }
 0x126   : > { %2371 = vmatprep.mubr.msk.bf16.mxu0 %vm704_vm0, %v675_v25 }
 0x12d   : > { %2372 = vmatmul.mubr.msk.bf16.gmra.mxu0 %vm704_vm0, %v676_v34 }
 0x12e   : > { %2375 = vmatprep.mubr.msk.bf16.mxu0 %vm704_vm0, %v677_v33 }
 0x135   : > { %2376 = vmatmul.mubr.msk.bf16.gmra.mxu0 %vm704_vm0, %v678_v39 }
 0x136   : > { %2379 = vmatprep.mubr.msk.bf16.mxu0 %vm704_vm0, %v679_v38 }
 0x13d   : > { %2380 = vmatmul.mubr.msk.bf16.gmra.mxu0 %vm704_vm0, %v680_v40 }
 0x13e   : > { %2447 = vmatprep.mubr.bf16.mxu0 %v2817_v19 }
 0x1c5   : > { %v2353_v44 = vpop.f32.mrf.mxu0 }
 0x1c6   : > { %v796_v49 = vadd.f32 %v2353_v44, %v2965_v45 }
 0x1c7   : > { %v787_v19 = vpop.f32.mrf.mxu0 }
 0x1c8   : > { %v788_v47 = vadd.f32 %v2965_v45, %v787_v19  ;;  %v916_v56 = vmax.f32 %v796_v49, 0.0 }
 0x1c9   : > { %v2354_v46 = vpop.f32.mrf.mxu0 }
 0x1ca   : > { %v799_v48 = vadd.f32 %v2354_v46, %v2965_v45  ;;  %v914_v54 = vmax.f32 %v788_v47, 0.0 }
 0x1cb   : > { %v790_v50 = vpop.f32.mrf.mxu0 }
 0x1cc   : > { %v791_v51 = vadd.f32 %v2965_v45, %v790_v50  ;;  %v917_v52 = vmax.f32 %v799_v48, 0.0 }
 0x1cd   : > { %v2357_v53 = vpop.f32.mrf.mxu0 }
 0x1ce   : > { %v915_v55 = vmax.f32 %v791_v51, 0.0  ;;  %v947_v61 = vpack.c.bf16 %v917_v52, %v916_v56  ;;  %v812_v1 = vadd.f32 %v2357_v53, %v2965_v45 }
 0x1cf   : > { %v803_v57 = vpop.f32.mrf.mxu0 }
 0x1d0   : > { %v946_v60 = vpack.c.bf16 %v915_v55, %v914_v54  ;;  %v804_v63 = vadd.f32 %v2965_v45, %v803_v57  ;;  %v920_v12 = vmax.f32 %v812_v1, 0.0 }
 0x1d1   : > { %v2358_v62 = vpop.f32.mrf.mxu0 }
 0x1d2   : > { %v815_v0 = vadd.f32 %v2358_v62, %v2965_v45  ;;  %2399 = vmatprep.mubr.bf16.mxu1 %v946_v60  ;;  %v918_v10 = vmax.f32 %v804_v63, 0.0 }
 0x1d3   : > { %v806_v3 = vpop.f32.mrf.mxu0  ;;  %2400 = vmatmul.mubr.bf16.vlgmr.msra.gmra.mxu1 %v947_v61 }
 0x1d4   : > { %v807_v4 = vadd.f32 %v2965_v45, %v806_v3  ;;  %v921_v8 = vmax.f32 %v815_v0, 0.0 }
 0x1d5   : > { %v2361_v9 = vpop.f32.mrf.mxu0 }
 0x1d6   : > { %v919_v11 = vmax.f32 %v807_v4, 0.0  ;;  %v949_v16 = vpack.c.bf16 %v921_v8, %v920_v12  ;;  %v828_v24 = vadd.f32 %v2361_v9, %v2965_v45 }
 0x1d7   : > { %v819_v13 = vpop.f32.mrf.mxu0 }
 0x1d8   : > { %v948_v15 = vpack.c.bf16 %v919_v11, %v918_v10  ;;  %v820_v22 = vadd.f32 %v2965_v45, %v819_v13  ;;  %v924_v35 = vmax.f32 %v828_v24, 0.0 }
 0x1d9   : > { %v2362_v21 = vpop.f32.mrf.mxu0 }
 0x1da   : > { %v831_v23 = vadd.f32 %v2362_v21, %v2965_v45  ;;  %2403 = vmatprep.mubr.bf16.mxu1 %v948_v15  ;;  %v922_v33 = vmax.f32 %v820_v22, 0.0 }
 0x1db   : > { %v822_v25 = vpop.f32.mrf.mxu0  ;;  %2404 = vmatmul.mubr.bf16.gmra.mxu1 %v949_v16 }
 0x1dc   : > { %v823_v26 = vadd.f32 %v2965_v45, %v822_v25  ;;  %v925_v30 = vmax.f32 %v831_v23, 0.0 }
 0x1dd   : > { %v2365_v31 = vpop.f32.mrf.mxu0 }
 0x1de   : > { %v923_v34 = vmax.f32 %v823_v26, 0.0  ;;  %v951_v39 = vpack.c.bf16 %v925_v30, %v924_v35  ;;  %v844_v43 = vadd.f32 %v2365_v31, %v2965_v45 }
 0x1df   : > { %v835_v36 = vpop.f32.mrf.mxu0 }
 0x1e0   : > { %v950_v38 = vpack.c.bf16 %v923_v34, %v922_v33  ;;  %v836_v41 = vadd.f32 %v2965_v45, %v835_v36  ;;  %v928_v50 = vmax.f32 %v844_v43, 0.0 }
 0x1e1   : > { %v2366_v40 = vpop.f32.mrf.mxu0 }
 0x1e2   : > { %v847_v42 = vadd.f32 %v2366_v40, %v2965_v45  ;;  %2407 = vmatprep.mubr.bf16.mxu1 %v950_v38  ;;  %v926_v48 = vmax.f32 %v836_v41, 0.0 }
 0x1e3   : > { %v838_v44 = vpop.f32.mrf.mxu0  ;;  %2408 = vmatmul.mubr.bf16.gmra.mxu1 %v951_v39 }
 0x1e4   : > { %v839_v19 = vadd.f32 %v2965_v45, %v838_v44  ;;  %v929_v46 = vmax.f32 %v847_v42, 0.0 }
 0x1e5   : > { %v2369_v47 = vpop.f32.mrf.mxu0 }
 0x1e6   : > { %v927_v49 = vmax.f32 %v839_v19, 0.0  ;;  %v953_v53 = vpack.c.bf16 %v929_v46, %v928_v50  ;;  %v860_v57 = vadd.f32 %v2369_v47, %v2965_v45 }
 0x1e7   : > { %v851_v51 = vpop.f32.mrf.mxu0 }
 0x1e8   : > { %v952_v52 = vpack.c.bf16 %v927_v49, %v926_v48  ;;  %v852_v55 = vadd.f32 %v2965_v45, %v851_v51  ;;  %v932_v3 = vmax.f32 %v860_v57, 0.0 }
 0x1e9   : > { %v2370_v54 = vpop.f32.mrf.mxu0 }
 0x1ea   : > { %v863_v56 = vadd.f32 %v2370_v54, %v2965_v45  ;;  %2411 = vmatprep.mubr.bf16.mxu1 %v952_v52  ;;  %v930_v0 = vmax.f32 %v852_v55, 0.0 }
 0x1eb   : > { %v854_v60 = vpop.f32.mrf.mxu0  ;;  %2412 = vmatmul.mubr.bf16.gmra.mxu1 %v953_v53 }
 0x1ec   : > { %v855_v61 = vadd.f32 %v2965_v45, %v854_v60  ;;  %v933_v62 = vmax.f32 %v863_v56, 0.0 }
 0x1ed   : > { %v2373_v63 = vpop.f32.mrf.mxu0 }
 0x1ee   : > { %v931_v1 = vmax.f32 %v855_v61, 0.0  ;;  %v955_v9 = vpack.c.bf16 %v933_v62, %v932_v3  ;;  %v876_v13 = vadd.f32 %v2373_v63, %v2965_v45 }
 0x1ef   : > { %v867_v4 = vpop.f32.mrf.mxu0 }
 0x1f0   : > { %v954_v8 = vpack.c.bf16 %v931_v1, %v930_v0  ;;  %v868_v11 = vadd.f32 %v2965_v45, %v867_v4  ;;  %v936_v25 = vmax.f32 %v876_v13, 0.0 }
 0x1f1   : > { %v2374_v10 = vpop.f32.mrf.mxu0 }
 0x1f2   : > { %v879_v12 = vadd.f32 %v2374_v10, %v2965_v45  ;;  %2415 = vmatprep.mubr.bf16.mxu1 %v954_v8  ;;  %v934_v23 = vmax.f32 %v868_v11, 0.0 }
 0x1f3   : > { %v870_v15 = vpop.f32.mrf.mxu0  ;;  %2416 = vmatmul.mubr.bf16.gmra.mxu1 %v955_v9 }
 0x1f4   : > { %v871_v16 = vadd.f32 %v2965_v45, %v870_v15  ;;  %v937_v21 = vmax.f32 %v879_v12, 0.0 }
 0x1f5   : > { %v2377_v22 = vpop.f32.mrf.mxu0 }
 0x1f6   : > { %v935_v24 = vmax.f32 %v871_v16, 0.0  ;;  %v957_v31 = vpack.c.bf16 %v937_v21, %v936_v25  ;;  %v892_v36 = vadd.f32 %v2377_v22, %v2965_v45 }
 0x1f7   : > { %v883_v26 = vpop.f32.mrf.mxu0 }
 0x1f8   : > { %v956_v30 = vpack.c.bf16 %v935_v24, %v934_v23  ;;  %v884_v34 = vadd.f32 %v2965_v45, %v883_v26  ;;  %v940_v44 = vmax.f32 %v892_v36, 0.0 }
 0x1f9   : > { %v2378_v33 = vpop.f32.mrf.mxu0 }
 0x1fa   : > { %v895_v35 = vadd.f32 %v2378_v33, %v2965_v45  ;;  %2419 = vmatprep.mubr.bf16.mxu1 %v956_v30  ;;  %v938_v42 = vmax.f32 %v884_v34, 0.0 }
 0x1fb   : > { %v886_v38 = vpop.f32.mrf.mxu0  ;;  %2420 = vmatmul.mubr.bf16.gmra.mxu1 %v957_v31 }
 0x1fc   : > { %v887_v39 = vadd.f32 %v2965_v45, %v886_v38  ;;  %v941_v40 = vmax.f32 %v895_v35, 0.0 }
 0x1fd   : > { %v2381_v41 = vpop.f32.mrf.mxu0 }
 0x1fe   : > { %v939_v43 = vmax.f32 %v887_v39, 0.0  ;;  %v959_v47 = vpack.c.bf16 %v941_v40, %v940_v44  ;;  %v908_v51 = vadd.f32 %v2381_v41, %v2965_v45 }
 0x1ff   : > { %v899_v19 = vpop.f32.mrf.mxu0 }
 0x200   : > { %v958_v46 = vpack.c.bf16 %v939_v43, %v938_v42  ;;  %v900_v49 = vadd.f32 %v2965_v45, %v899_v19  ;;  %v944_v57 = vmax.f32 %v908_v51, 0.0 }
 0x201   : > { %v2382_v48 = vpop.f32.mrf.mxu0 }
 0x202   : > { %v911_v50 = vadd.f32 %v2382_v48, %v2965_v45  ;;  %2423 = vmatprep.mubr.bf16.mxu1 %v958_v46  ;;  %v942_v55 = vmax.f32 %v900_v49, 0.0 }
 0x203   : > { %v902_v52 = vpop.f32.mrf.mxu0  ;;  %2424 = vmatmul.mubr.bf16.gmra.mxu1 %v959_v47 }
 0x204   : > { %v903_v53 = vadd.f32 %v2965_v45, %v902_v52  ;;  %v945_v54 = vmax.f32 %v911_v50, 0.0 }
 0x206   : > { %v943_v56 = vmax.f32 %v903_v53, 0.0  ;;  %v961_v61 = vpack.c.bf16 %v945_v54, %v944_v57  ;;  %v1676_v57 = vld [vmem:[%s3221_s6 + $0x18] sm:$0xff] }
 0x208   : > { %v960_v60 = vpack.c.bf16 %v943_v56, %v942_v55  ;;  %v1677_v56 = vld [vmem:[%s3221_s6 + $0x20] sm:$0xff] }
 0x20a   : > { %2427 = vmatprep.mubr.bf16.mxu1 %v960_v60  ;;  %v1675_v60 = vld [vmem:[%s3221_s6 + $0x10] sm:$0xff] }
 0x20b   : > { %2428 = vmatmul.mubr.bf16.gmra.mxu1 %v961_v61  ;;  %v1674_v61 = vld [vmem:[%s3221_s6 + $0x8] sm:$0xff] }
 0x20c   : > { %2479 = vmatprep.mubr.bf16.mxu1 %v2832_v37 }
 0x293   : > { %v2401_v62 = vpop.f32.mrf.mxu1 }
 0x295   : > { %v1060_v63 = vpop.f32.mrf.mxu1 }
 0x297   : > { %v2402_v0 = vpop.f32.mrf.mxu1 }
 0x298   : > { %v1188_v42 = vpack.c.bf16 %v2402_v0, %v2401_v62  ;;  %v1673_v62 = vld [vmem:[%s3221_s6] sm:$0xff] }
 0x299   : > { %v1063_v1 = vpop.f32.mrf.mxu1  ;;  %v3065_v0 = vld [vmem:[%s3220_s5] ss:$0 sm:$0xff] }
 0x29a   : > { %v1187_v19 = vpack.c.bf16 %v1063_v1, %v1060_v63 }
 0x29b   : > { %v2405_v3 = vpop.f32.mrf.mxu1 }
 0x29d   : > { %v1076_v4 = vpop.f32.mrf.mxu1 }
 0x29f   : > { %v2406_v8 = vpop.f32.mrf.mxu1 }
 0x2a0   : > { %v1190_v35 = vpack.c.bf16 %v2406_v8, %v2405_v3 }
 0x2a1   : > { %v1079_v9 = vpop.f32.mrf.mxu1 }
 0x2a2   : > { %v1189_v39 = vpack.c.bf16 %v1079_v9, %v1076_v4 }
 0x2a3   : > { %v2409_v10 = vpop.f32.mrf.mxu1 }
 0x2a5   : > { %v1092_v45 = vpop.f32.mrf.mxu1 }
 0x2a7   : > { %v2410_v11 = vpop.f32.mrf.mxu1 }
 0x2a8   : > { %v1192_v25 = vpack.c.bf16 %v2410_v11, %v2409_v10 }
 0x2a9   : > { %v1095_v12 = vpop.f32.mrf.mxu1 }
 0x2aa   : > { %v1191_v31 = vpack.c.bf16 %v1095_v12, %v1092_v45 }
 0x2ab   : > { %v2413_v13 = vpop.f32.mrf.mxu1 }
 0x2ad   : > { %v1108_v15 = vpop.f32.mrf.mxu1 }
 0x2af   : > { %v2414_v16 = vpop.f32.mrf.mxu1 }
 0x2b0   : > { %v1194_v21 = vpack.c.bf16 %v2414_v16, %v2413_v13 }
 0x2b1   : > { %v1111_v22 = vpop.f32.mrf.mxu1 }
 0x2b2   : > { %v1193_v23 = vpack.c.bf16 %v1111_v22, %v1108_v15  ;;  %2431 = vmatprep.subr.bf16.mxu0 %v1194_v21 }
 0x2b3   : > { %v2417_v37 = vpop.f32.mrf.mxu1  ;;  %2432 = vmatpush3.bf16.msra.mxu0 %v1194_v21 }
 0x2b4   : > { %2433 = vmatprep.subr.bf16.mxu0 %v1193_v23 }
 0x2b5   : > { %v1124_v24 = vpop.f32.mrf.mxu1 }
 0x2b7   : > { %v2418_v26 = vpop.f32.mrf.mxu1  ;;  %2434 = vmatpush3.bf16.msra.mxu0 %v1193_v23 }
 0x2b8   : > { %2435 = vmatprep.subr.bf16.mxu0 %v1192_v25 }
 0x2b9   : > { %v1127_v30 = vpop.f32.mrf.mxu1 }
 0x2bb   : > { %v2421_v33 = vpop.f32.mrf.mxu1  ;;  %2436 = vmatpush3.bf16.msra.mxu0 %v1192_v25 }
 0x2bc   : > { %2437 = vmatprep.subr.bf16.mxu0 %v1191_v31 }
 0x2bd   : > { %v1140_v34 = vpop.f32.mrf.mxu1 }
 0x2bf   : > { %v2422_v36 = vpop.f32.mrf.mxu1  ;;  %2438 = vmatpush3.bf16.msra.mxu0 %v1191_v31 }
 0x2c0   : > { %2439 = vmatprep.subr.bf16.mxu0 %v1190_v35  ;;  %v1198_v54 = vpack.c.bf16 %v2422_v36, %v2421_v33 }
 0x2c1   : > { %v1143_v38 = vpop.f32.mrf.mxu1 }
 0x2c2   : > { %v1197_v55 = vpack.c.bf16 %v1143_v38, %v1140_v34 }
 0x2c3   : > { %v2425_v40 = vpop.f32.mrf.mxu1  ;;  %2440 = vmatpush3.bf16.msra.mxu0 %v1190_v35 }
 0x2c4   : > { %2441 = vmatprep.subr.bf16.mxu0 %v1189_v39 }
 0x2c5   : > { %v1156_v41 = vpop.f32.mrf.mxu1 }
 0x2c7   : > { %v2426_v43 = vpop.f32.mrf.mxu1  ;;  %2442 = vmatpush3.bf16.msra.mxu0 %v1189_v39 }
 0x2c8   : > { %2443 = vmatprep.subr.bf16.mxu0 %v1188_v42  ;;  %v1200_v52 = vpack.c.bf16 %v2426_v43, %v2425_v40 }
 0x2c9   : > { %v1159_v44 = vpop.f32.mrf.mxu1 }
 0x2ca   : > { %v1199_v53 = vpack.c.bf16 %v1159_v44, %v1156_v41 }
 0x2cb   : > { %v2429_v46 = vpop.f32.mrf.mxu1  ;;  %2444 = vmatpush3.bf16.msra.mxu0 %v1188_v42 }
 0x2cc   : > { %2445 = vmatprep.subr.bf16.mxu0 %v1187_v19 }
 0x2cd   : > { %v1172_v47 = vpop.f32.mrf.mxu1 }
 0x2cf   : > { %v2430_v48 = vpop.f32.mrf.mxu1  ;;  %2446 = vmatpush3.bf16.msra.mxu0 %v1187_v19 }
 0x2d0   : > { %v1202_v49 = vpack.c.bf16 %v2430_v48, %v2429_v46 }
 0x2d1   : > { %v1175_v50 = vpop.f32.mrf.mxu1 }
 0x2d2   : > { %v1201_v51 = vpack.c.bf16 %v1175_v50, %v1172_v47  ;;  %2463 = vmatprep.subr.bf16.mxu1 %v1202_v49  ;;  %2448 = vmatmul.mubr.bf16.vlgmr.msra.gmra.mxu0 %v2849_v58  ;;  %v1196_v58 = vpack.c.bf16 %v2418_v26, %v2417_v37 }
 0x2d3   : > { %2464 = vmatpush3.bf16.msra.mxu1 %v1202_v49  ;;  %2451 = vmatprep.mubr.bf16.mxu0 %v2851_v59  ;;  %v1195_v59 = vpack.c.bf16 %v1127_v30, %v1124_v24 }
 0x2d4   : > { %2465 = vmatprep.subr.bf16.mxu1 %v1201_v51 }
 0x2d7   : > { %2466 = vmatpush3.bf16.msra.mxu1 %v1201_v51 }
 0x2d8   : > { %2467 = vmatprep.subr.bf16.mxu1 %v1200_v52 }
 0x2da   : > { %2452 = vmatmul.mubr.bf16.gmra.mxu0 %v2867_v6  ;;  %v2685_v6 = vmov 0.0  }
 0x2db   : > { %2468 = vmatpush3.bf16.msra.mxu1 %v1200_v52  ;;  %2455 = vmatprep.mubr.bf16.mxu0 %v2869_v7  ;;  %v1688_v7 = vld [vmem:[%s3221_s6 + $0x78] sm:$0xff] }
 0x2dc   : > { %2469 = vmatprep.subr.bf16.mxu1 %v1199_v53  ;;  %2495 = vmatprep.subr.mxu0 %v2685_v6 }
 0x2dd   : > { %2496 = vmatpush3.msra.mxu0 %v1688_v7 }
 0x2de   : > { %2497 = vmatprep.subr.mxu0 %v2685_v6 }
 0x2df   : > { %2470 = vmatpush3.bf16.msra.mxu1 %v1199_v53 }
 0x2e0   : > { %2471 = vmatprep.subr.bf16.mxu1 %v1198_v54 }
 0x2e2   : > { %2456 = vmatmul.mubr.bf16.gmra.mxu0 %v2887_v18  ;;  %v1683_v18 = vld [vmem:[%s3221_s6 + $0x50] sm:$0xff] }
 0x2e3   : > { %2472 = vmatpush3.bf16.msra.mxu1 %v1198_v54  ;;  %2459 = vmatprep.mubr.bf16.mxu0 %v2889_v20  ;;  %v1682_v20 = vld [vmem:[%s3221_s6 + $0x48] sm:$0xff] }
 0x2e4   : > { %2473 = vmatprep.subr.bf16.mxu1 %v1197_v55 }
 0x2e7   : > { %2474 = vmatpush3.bf16.msra.mxu1 %v1197_v55 }
 0x2e8   : > { %2475 = vmatprep.subr.bf16.mxu1 %v1196_v58 }
 0x2ea   : > { %2460 = vmatmul.mubr.bf16.gmra.mxu0 %v2905_v29  ;;  %v1679_v29 = vld [vmem:[%s3221_s6 + $0x30] sm:$0xff] }
 0x2eb   : > { %2476 = vmatpush3.bf16.msra.mxu1 %v1196_v58  ;;  %2527 = vmatprep.mubr.msk.f32.mxu0 %vm2686_vm1, %v2685_v6 }
 0x2ec   : > { %2477 = vmatprep.subr.bf16.mxu1 %v1195_v59 }
 0x2ef   : > { %2478 = vmatpush3.bf16.msra.mxu1 %v1195_v59 }
 0x2f2   : > { %2480 = vmatmul.mubr.bf16.vlgmr.msra.gmra.mxu1 %v2861_v2  ;;  %v1687_v2 = vld [vmem:[%s3221_s6 + $0x70] sm:$0xff] }
 0x2f3   : > { %2483 = vmatprep.mubr.bf16.mxu1 %v2865_v5  ;;  %2498 = vmatpush3.msra.mxu0 %v1687_v2  ;;  %v1686_v5 = vld [vmem:[%s3221_s6 + $0x68] sm:$0xff] }
 0x2f4   : > { %2499 = vmatprep.subr.mxu0 %v2685_v6 }
 0x2f5   : > { %2500 = vmatpush3.msra.mxu0 %v1686_v5 }
 0x2f6   : > { %2501 = vmatprep.subr.mxu0 %v2685_v6 }
 0x2fa   : > { %2484 = vmatmul.mubr.bf16.gmra.mxu1 %v2881_v14  ;;  %v1685_v14 = vld [vmem:[%s3221_s6 + $0x60] sm:$0xff] }
 0x2fb   : > { %2487 = vmatprep.mubr.bf16.mxu1 %v2885_v17  ;;  %2502 = vmatpush3.msra.mxu0 %v1685_v14  ;;  %v1684_v17 = vld [vmem:[%s3221_s6 + $0x58] sm:$0xff] }
 0x2fc   : > { %2503 = vmatprep.subr.mxu0 %v2685_v6 }
 0x2fd   : > { %2504 = vmatpush3.msra.mxu0 %v1684_v17 }
 0x2fe   : > { %2505 = vmatprep.subr.mxu0 %v2685_v6 }
 0x2ff   : > { %2506 = vmatpush3.msra.mxu0 %v1683_v18 }
 0x300   : > { %2507 = vmatprep.subr.mxu0 %v2685_v6 }
 0x301   : > { %2508 = vmatpush3.msra.mxu0 %v1682_v20 }
 0x302   : > { %2488 = vmatmul.mubr.bf16.gmra.mxu1 %v2901_v27  ;;  %2509 = vmatprep.subr.mxu0 %v2685_v6  ;;  %v1681_v27 = vld [vmem:[%s3221_s6 + $0x40] sm:$0xff] }
 0x303   : > { %2491 = vmatprep.mubr.bf16.mxu1 %v2903_v28  ;;  %2510 = vmatpush3.msra.mxu0 %v1681_v27  ;;  %v1680_v28 = vld [vmem:[%s3221_s6 + $0x38] sm:$0xff] }
 0x304   : > { %2511 = vmatprep.subr.mxu0 %v2685_v6 }
 0x305   : > { %2512 = vmatpush3.msra.mxu0 %v1680_v28 }
 0x306   : > { %2513 = vmatprep.subr.mxu0 %v2685_v6 }
 0x307   : > { %2514 = vmatpush3.msra.mxu0 %v1679_v29 }
 0x308   : > { %2515 = vmatprep.subr.mxu0 %v2685_v6 }
 0x30a   : > { %2492 = vmatmul.mubr.bf16.gmra.mxu1 %v2912_v32  ;;  %v1678_v32 = vld [vmem:[%s3221_s6 + $0x28] sm:$0xff] }
 0x30b   : > { %2516 = vmatpush3.msra.mxu0 %v1678_v32 }
 0x30c   : > { %2517 = vmatprep.subr.mxu0 %v2685_v6 }
 0x30d   : > { %2518 = vmatpush3.msra.mxu0 %v1677_v56 }
 0x30e   : > { %2519 = vmatprep.subr.mxu0 %v2685_v6 }
 0x30f   : > { %2520 = vmatpush3.msra.mxu0 %v1676_v57 }
 0x310   : > { %2521 = vmatprep.subr.mxu0 %v2685_v6 }
 0x311   : > { %2522 = vmatpush3.msra.mxu0 %v1675_v60 }
 0x312   : > { %2523 = vmatprep.subr.mxu0 %v2685_v6 }
 0x313   : > { %2524 = vmatpush3.msra.mxu0 %v1674_v61 }
 0x314   : > { %2525 = vmatprep.subr.mxu0 %v2685_v6 }
 0x315   : > { %2526 = vmatpush3.msra.mxu0 %v1673_v62 }
 0x392   : > { %v2449_v63 = vpop.f32.mrf.mxu0 }
 0x393   : > { %v1406_v3 = vadd.f32 %v2449_v63, %v3065_v0 }
 0x394   : > { %v1237_v1 = vpop.f32.mrf.mxu0 }
 0x395   : > { %v1404_v4 = vadd.f32 %v3065_v0, %v1237_v1  ;;  %v1438_v45 = vmax.f32 %v1406_v3, 0.0 }
 0x396   : > { %v2450_v8 = vpop.f32.mrf.mxu0 }
 0x397   : > { %v1407_v9 = vadd.f32 %v2450_v8, %v3065_v0  ;;  %v1436_v11 = vmax.f32 %v1404_v4, 0.0 }
 0x398   : > { %v1240_v10 = vpop.f32.mrf.mxu0 }
 0x399   : > { %v1439_v12 = vmax.f32 %v1407_v9, 0.0  ;;  %v1405_v13 = vadd.f32 %v3065_v0, %v1240_v10 }
 0x39a   : > { %v2453_v15 = vpop.f32.mrf.mxu0 }
 0x39b   : > { %v2073_v16 = vpack.c.bf16 %v1439_v12, %v1438_v45  ;;  %v1437_v21 = vmax.f32 %v1405_v13, 0.0  ;;  %v1410_v24 = vadd.f32 %v2453_v15, %v3065_v0 }
 0x39c   : > { %v1253_v22 = vpop.f32.mrf.mxu0 }
 0x39d   : > { %2145 = vst [vmem:[%s3075_s27 + $0x8] sm:$0xff] %v2073_v16   ;;  %v2068_v23 = vpack.c.bf16 %v1437_v21, %v1436_v11  ;;  %v1628_v37 = vadd.f32 %v1437_v21, %v1436_v11  ;;  %v1408_v25 = vadd.f32 %v3065_v0, %v1253_v22  ;;  %v1442_v35 = vmax.f32 %v1410_v24, 0.0 }
 0x39e   : > { %v2454_v26 = vpop.f32.mrf.mxu0 }
 0x39f   : > { %2069 = vst [vmem:[%s3075_s27] sm:$0xff] %v2068_v23   ;;  %v1629_v30 = vadd.f32 %v1628_v37, %v1438_v45  ;;  %v1440_v31 = vmax.f32 %v1408_v25, 0.0  ;;  %v1411_v33 = vadd.f32 %v2454_v26, %v3065_v0 }
 0x3a0   : > { %v1256_v34 = vpop.f32.mrf.mxu0 }
 0x3a1   : > { %v1630_v36 = vadd.f32 %v1629_v30, %v1439_v12  ;;  %v1443_v38 = vmax.f32 %v1411_v33, 0.0  ;;  %v1409_v39 = vadd.f32 %v3065_v0, %v1256_v34 }
 0x3a2   : > { %v2457_v40 = vpop.f32.mrf.mxu0 }
 0x3a3   : > { %v1631_v41 = vadd.f32 %v1630_v36, %v1440_v31  ;;  %v2083_v42 = vpack.c.bf16 %v1443_v38, %v1442_v35  ;;  %v1441_v43 = vmax.f32 %v1409_v39, 0.0  ;;  %v1414_v47 = vadd.f32 %v2457_v40, %v3065_v0 }
 0x3a4   : > { %v1269_v44 = vpop.f32.mrf.mxu0 }
 0x3a5   : > { %2147 = vst [vmem:[%s3075_s27 + $0x18] sm:$0xff] %v2083_v42   ;;  %v2078_v19 = vpack.c.bf16 %v1441_v43, %v1440_v31  ;;  %v1632_v46 = vadd.f32 %v1631_v41, %v1441_v43  ;;  %v1412_v50 = vadd.f32 %v3065_v0, %v1269_v44  ;;  %v1446_v53 = vmax.f32 %v1414_v47, 0.0 }
 0x3a6   : > { %v2458_v48 = vpop.f32.mrf.mxu0 }
 0x3a7   : > { %2146 = vst [vmem:[%s3075_s27 + $0x10] sm:$0xff] %v2078_v19   ;;  %v1633_v49 = vadd.f32 %v1632_v46, %v1442_v35  ;;  %v1415_v51 = vadd.f32 %v2458_v48, %v3065_v0  ;;  %v1444_v59 = vmax.f32 %v1412_v50, 0.0 }
 0x3a8   : > { %v1272_v52 = vpop.f32.mrf.mxu0 }
 0x3a9   : > { %v1447_v54 = vmax.f32 %v1415_v51, 0.0  ;;  %v1413_v55 = vadd.f32 %v3065_v0, %v1272_v52  ;;  %v1634_v6 = vadd.f32 %v1633_v49, %v1443_v38 }
 0x3aa   : > { %v2461_v58 = vpop.f32.mrf.mxu0 }
 0x3ab   : > { %v2093_v7 = vpack.c.bf16 %v1447_v54, %v1446_v53  ;;  %v1445_v2 = vmax.f32 %v1413_v55, 0.0  ;;  %v3091_v17 = vadd.f32 %v2461_v58, %v3065_v0  ;;  %v1635_v20 = vadd.f32 %v1634_v6, %v1444_v59 }
 0x3ac   : > { %v1285_v5 = vpop.f32.mrf.mxu0 }
 0x3ad   : > { %2149 = vst [vmem:[%s3075_s27 + $0x28] sm:$0xff] %v2093_v7   ;;  %v2088_v14 = vpack.c.bf16 %v1445_v2, %v1444_v59  ;;  %v1416_v27 = vadd.f32 %v3065_v0, %v1285_v5  ;;  %v1450_v32 = vmax.f32 %v3091_v17, 0.0  ;;  %v1636_v61 = vadd.f32 %v1635_v20, %v1445_v2 }
 0x3ae   : > { %v2462_v18 = vpop.f32.mrf.mxu0 }
 0x3af   : > { %2148 = vst [vmem:[%s3075_s27 + $0x20] sm:$0xff] %v2088_v14   ;;  %v3096_v28 = vadd.f32 %v2462_v18, %v3065_v0  ;;  %v1448_v62 = vmax.f32 %v1416_v27, 0.0  ;;  %v1637_v11 = vadd.f32 %v1636_v61, %v1446_v53 }
 0x3b0   : > { %v1288_v29 = vpop.f32.mrf.mxu0 }
 0x3b1   : > { %v1451_v56 = vmax.f32 %v3096_v28, 0.0  ;;  %v1417_v57 = vadd.f32 %v3065_v0, %v1288_v29  ;;  %v1638_v24 = vadd.f32 %v1637_v11, %v1447_v54 }
 0x3b2   : > { %v2481_v60 = vpop.f32.mrf.mxu1 }
 0x3b3   : > { %v2103_v63 = vpack.c.bf16 %v1451_v56, %v1450_v32  ;;  %v1449_v1 = vmax.f32 %v1417_v57, 0.0  ;;  %v1422_v4 = vadd.f32 %v2481_v60, %v3065_v0  ;;  %v1639_v38 = vadd.f32 %v1638_v24, %v1448_v62 }
 0x3b4   : > { %v1334_v3 = vpop.f32.mrf.mxu1 }
 0x3b5   : > { %2151 = vst [vmem:[%s3075_s27 + $0x38] sm:$0xff] %v2103_v63   ;;  %v2098_v8 = vpack.c.bf16 %v1449_v1, %v1448_v62  ;;  %v1420_v10 = vadd.f32 %v3065_v0, %v1334_v3  ;;  %v1454_v13 = vmax.f32 %v1422_v4, 0.0  ;;  %v1640_v49 = vadd.f32 %v1639_v38, %v1449_v1 }
 0x3b6   : > { %v2482_v9 = vpop.f32.mrf.mxu1 }
 0x3b7   : > { %v1423_v45 = vadd.f32 %v2482_v9, %v3065_v0  ;;  %2150 = vst [vmem:[%s3075_s27 + $0x30] sm:$0xff] %v2098_v8   ;;  %v1452_v22 = vmax.f32 %v1420_v10, 0.0  ;;  %v1641_v6 = vadd.f32 %v1640_v49, %v1450_v32 }
 0x3b8   : > { %v1337_v12 = vpop.f32.mrf.mxu1 }
 0x3b9   : > { %v1455_v15 = vmax.f32 %v1423_v45, 0.0  ;;  %v1421_v16 = vadd.f32 %v3065_v0, %v1337_v12  ;;  %v1642_v60 = vadd.f32 %v1641_v6, %v1451_v56 }
 0x3ba   : > { %v2485_v21 = vpop.f32.mrf.mxu1 }
 0x3bb   : > { %v2113_v23 = vpack.c.bf16 %v1455_v15, %v1454_v13  ;;  %v1453_v37 = vmax.f32 %v1421_v16, 0.0  ;;  %v1426_v25 = vadd.f32 %v2485_v21, %v3065_v0  ;;  %v1643_v9 = vrot.slane %v1642_v60, 4 }
 0x3bc   : > { %v1350_v26 = vpop.f32.mrf.mxu1 }
 0x3bd   : > { %2153 = vst [vmem:[%s3075_s27 + $0x48] sm:$0xff] %v2113_v23   ;;  %v2108_v30 = vpack.c.bf16 %v1453_v37, %v1452_v22  ;;  %v1649_v31 = vadd.f32 %v1453_v37, %v1452_v22  ;;  %v1424_v33 = vadd.f32 %v3065_v0, %v1350_v26  ;;  %v1458_v39 = vmax.f32 %v1426_v25, 0.0 }
 0x3be   : > { %v2486_v34 = vpop.f32.mrf.mxu1  ;;  %v1644_v16 = vadd.f32 %v1643_v9, %v1642_v60 }
 0x3bf   : > { %2152 = vst [vmem:[%s3075_s27 + $0x40] sm:$0xff] %v2108_v30   ;;  %v1650_v35 = vadd.f32 %v1649_v31, %v1454_v13  ;;  %v1427_v36 = vadd.f32 %v2486_v34, %v3065_v0  ;;  %v1456_v41 = vmax.f32 %v1424_v33, 0.0 }
 0x3c0   : > { %v1353_v40 = vpop.f32.mrf.mxu1  ;;  %v1645_v37 = vrot.slane %v1644_v16, 2 }
 0x3c1   : > { %v1651_v42 = vadd.f32 %v1650_v35, %v1455_v15  ;;  %v1459_v43 = vmax.f32 %v1427_v36, 0.0  ;;  %v1425_v44 = vadd.f32 %v3065_v0, %v1353_v40 }
 0x3c2   : > { %v2489_v19 = vpop.f32.mrf.mxu1  ;;  %v1646_v26 = vadd.f32 %v1645_v37, %v1644_v16 }
 0x3c3   : > { %v1652_v46 = vadd.f32 %v1651_v42, %v1456_v41  ;;  %v2123_v47 = vpack.c.bf16 %v1459_v43, %v1458_v39  ;;  %v1457_v48 = vmax.f32 %v1425_v44, 0.0  ;;  %v1430_v50 = vadd.f32 %v2489_v19, %v3065_v0  ;;  %v2020_v42 = vld [vmem:[%s3222_s7] ss:$0 sm:$0xff] }
 0x3c4   : > { %v1366_v51 = vpop.f32.mrf.mxu1  ;;  %v1647_v34 = vrot.slane %v1646_v26, 1 }
 0x3c5   : > { %2155 = vst [vmem:[%s3075_s27 + $0x58] sm:$0xff] %v2123_v47   ;;  %v2118_v52 = vpack.c.bf16 %v1457_v48, %v1456_v41  ;;  %v1653_v53 = vadd.f32 %v1652_v46, %v1457_v48  ;;  %v1428_v54 = vadd.f32 %v3065_v0, %v1366_v51  ;;  %v1462_v7 = vmax.f32 %v1430_v50, 0.0 }
 0x3c6   : > { %v2490_v55 = vpop.f32.mrf.mxu1  ;;  %v1648_v36 = vadd.f32 %v1647_v34, %v1646_v26 }
 0x3c7   : > { %2154 = vst [vmem:[%s3075_s27 + $0x50] sm:$0xff] %v2118_v52   ;;  %v1654_v58 = vadd.f32 %v1653_v53, %v1458_v39  ;;  %v1431_v59 = vadd.f32 %v2490_v55, %v3065_v0  ;;  %v1460_v5 = vmax.f32 %v1428_v54, 0.0 }
 0x3c8   : > { %v1369_v2 = vpop.f32.mrf.mxu1  ;;  %v1671_v39 = vmul.f32 0.0078125, %v1648_v36 }
 0x3c9   : > { %v1655_v14 = vadd.f32 %v1654_v58, %v1459_v43  ;;  %v1463_v17 = vmax.f32 %v1431_v59, 0.0  ;;  %v1429_v18 = vadd.f32 %v3065_v0, %v1369_v2 }
 0x3ca   : > { %v2493_v20 = vpop.f32.mrf.mxu1 }
 0x3cb   : > { %v1656_v27 = vadd.f32 %v1655_v14, %v1460_v5  ;;  %v2133_v29 = vpack.c.bf16 %v1463_v17, %v1462_v7  ;;  %v1461_v57 = vmax.f32 %v1429_v18, 0.0  ;;  %v1434_v61 = vadd.f32 %v2493_v20, %v3065_v0 }
 0x3cc   : > { %v1382_v62 = vpop.f32.mrf.mxu1 }
 0x3cd   : > { %2157 = vst [vmem:[%s3075_s27 + $0x68] sm:$0xff] %v2133_v29   ;;  %v2128_v32 = vpack.c.bf16 %v1461_v57, %v1460_v5  ;;  %v1657_v63 = vadd.f32 %v1656_v27, %v1461_v57  ;;  %v1432_v1 = vadd.f32 %v3065_v0, %v1382_v62  ;;  %v1466_v10 = vmax.f32 %v1434_v61, 0.0 }
 0x3ce   : > { %v2494_v3 = vpop.f32.mrf.mxu1 }
 0x3cf   : > { %2156 = vst [vmem:[%s3075_s27 + $0x60] sm:$0xff] %v2128_v32   ;;  %v1658_v4 = vadd.f32 %v1657_v63, %v1462_v7  ;;  %v1435_v8 = vadd.f32 %v2494_v3, %v3065_v0  ;;  %v1464_v28 = vmax.f32 %v1432_v1, 0.0 }
 0x3d0   : > { %v1385_v45 = vpop.f32.mrf.mxu1 }
 0x3d1   : > { %v1659_v56 = vadd.f32 %v1658_v4, %v1463_v17  ;;  %v1467_v11 = vmax.f32 %v1435_v8, 0.0  ;;  %v1433_v12 = vadd.f32 %v3065_v0, %v1385_v45 }
 0x3d3   : > { %v1660_v13 = vadd.f32 %v1659_v56, %v1464_v28  ;;  %v2143_v15 = vpack.c.bf16 %v1467_v11, %v1466_v10  ;;  %v1465_v21 = vmax.f32 %v1433_v12, 0.0 }
 0x3d5   : > { %2159 = vst [vmem:[%s3075_s27 + $0x78] sm:$0xff] %v2143_v15   ;;  %v2138_v22 = vpack.c.bf16 %v1465_v21, %v1464_v28  ;;  %v1661_v23 = vadd.f32 %v1660_v13, %v1465_v21 }
 0x3d7   : > { %2158 = vst [vmem:[%s3075_s27 + $0x70] sm:$0xff] %v2138_v22   ;;  %v1662_v24 = vadd.f32 %v1661_v23, %v1466_v10  ;;  %s2599_s27 = scalar_lea.vmem %s2598_s28, 4096 }
 0x3d8   : > { %p2601_p1 = scmp.lt.s32.totalorder %s2599_s27, %s2593_s24 }
 0x3d9   : > { %v1663_v25 = vadd.f32 %v1662_v24, %v1467_v11 }
 0x3da   : > { %p2602_p2 = por %p2601_p1, %p2600_p0 }
 0x3db   : > { %v1664_v30 = vrot.slane %v1663_v25, 4 }
 0x3dc   : > { %p2603_p3 = pnand %p2602_p2, %p2596_p13 }
 0x3dd   : > { %v1665_v31 = vadd.f32 %v1664_v30, %v1663_v25 }
 0x3df   : > { %v1666_v33 = vrot.slane %v1665_v31, 2 }
 0x3e1   : > { %v1667_v35 = vadd.f32 %v1666_v33, %v1665_v31 }
 0x3e3   : > { %v1668_v0 = vrot.slane %v1667_v35, 1 }
 0x3e5   : > { %v1669_v38 = vadd.f32 %v1668_v0, %v1667_v35 }
 0x3e7   : > { %v1672_v40 = vmul.f32 0.0078125, %v1669_v38 }
 0x3e9   : > { %v1699_v41 = vsel %vm1698_vm2, %v1672_v40, %v1671_v39 }
 0x3ea   : > { %2528 = vmatmul.mubr.f32.vlgmr.msra.gmra.mxu0 %v1699_v41 }
 0x4aa   : > { %v1767_v43 = vpop.f32.mrf.mxu0 }
 0x4ab   : > { %v1768_v44 = vadd.f32 %v2020_v42, %v1767_v43 }
 0x4ac   : > { %v2529_v19 = vpop.f32.mrf.mxu0 }
 0x4ad   : > { %v1771_v46 = vmul.f32 %v1768_v44, %v1768_v44 }
 0x4af   : > { %v1773_v47 = vsel %vm1772_vm3, %v1771_v46, 0.0 }
 0x4b0   : > { %1774 = vadd.xlane.f32.xlu0 %v1773_v47 }
 0x4b1   : > { %2606 = shalt.err (!%p2603_p3)
}
 0x4b2   : > { %s2607_s29 = scalar_lea.hbm %s3139_s22, 2048  ;;  %s2611_s21 = scalar_lea.hbm %s3223_s8, 8192 }
 0x4b3   : > { %p2608_p4 = scmp.ne.s32.totalorder %s3139_s22, %s2607_s29  ;;  %p2612_p9 = scmp.lt.s32.totalorder %s3139_s22, %s3223_s8 }
 0x4b4   : > { %p2613_p10 = scmp.lt.s32.totalorder %s2611_s21, %s2607_s29 }
 0x4b5   : > { %p2609_p7 = pnand %p2608_p4, %p2782_p5 }
 0x4b6   : > { %p2614_p11 = por %p2613_p10, %p2612_p9 }
 0x4b7   : > { %p2610_p8 = pneg %p2609_p7 }
 0x4b9   : > { %p2615_p12 = pnand %p2614_p11, %p2610_p8 }
 0x4bb   : > { %2618 = shalt.err (!%p2615_p12)
}
 0x4bc   : > { %s2688_s24 = smov 64   ;;  %s2689_s28 = smov 4   ;;  %v2690_v50 = vmov 1966171168   ;;  %v1783_v52 = vlaneseq  ;;  %vm1804_vm4 = vcmask 253952  }
 0x4bd   : > { %s3227_s27 = scalar_lea.sflag [#allocation3], %s3068_s25  ;;  %v1781_v51 = vunpack.c.l.s4 %v2690_v50  ;;  %s1953_s23 = sshll.u32 %s3068_s25, 1 }
 0x4be   : > { %2530 = dma.vmem_to_hbm [thread:$0]  (%p2782_p5), %s3141_s16, 2048, %s3139_s22, %s3227_s27, %s2688_s24, %s2688_s24, %s2689_s28   ;;  %v1784_v54 = vshrl.u32 %v1783_v52, 7 }
 0x4bf   : > { %v1782_v53 = vunpack.c.0.s8 %v1781_v51  ;;  %s2064_s29 = sshll.u32 %s2765_s13, 5  ;;  %s357_s14 = scalar_lea.vmem [#allocation4], %s1953_s23 }
 0x4c0   : > { %s1842_s17 = sshll.u32 %s357_s14, 4  ;;  %s3171_s21 = scalar_lea.hbm %s3224_s9, %s2064_s29  ;;  %s3173_s17 = int_to_ptr.vmem [resolvable:$true] %s1842_s17 }
 0x4c1   : > { %v1785_v55 = vsub.s32 %v1782_v53, %v1784_v54  ;;  %s1813_s26 = scalar_lea.sflag [#allocation5], %s3068_s25  ;;  %s2619_s13 = scalar_lea.vmem %s3173_s17, 32 }
 0x4c2   : > { %p2620_p13 = scmp.ne.s32.totalorder %s3173_s17, %s2619_s13  ;;  %s2691_s24 = smov [#allocation4]  }
 0x4c3   : > { %s2623_s28 = sshll.u32 %s2691_s24, 4  ;;  %s2624_s28 = int_to_ptr.vmem [resolvable:$false] %s2623_s28 }
 0x4c4   : > { %p2621_p0 = pnand %p2620_p13, %p2782_p5  ;;  %s2625_s27 = scalar_lea.vmem %s2624_s28, 64 }
 0x4c5   : > { %p2626_p2 = scmp.lt.s32.totalorder %s3173_s17, %s2624_s28  ;;  %p2627_p3 = scmp.lt.s32.totalorder %s2625_s27, %s2619_s13 }
 0x4c6   : > { %p2622_p1 = pneg %p2621_p0 }
 0x4c7   : > { %p2628_p4 = por %p2627_p3, %p2626_p2 }
 0x4c9   : > { %p2629_p7 = pnand %p2628_p4, %p2622_p1 }
 0x539   : > { %v1775_v48 = vpop.xlane.xlu0 %1774 }
 0x53a   : > { %v1776_v49 = vmax.f32 %v1775_v48, 1e-24 }
 0x53c   : > { %2591 = vrsqrt.f32 %v1776_v49 }
 0x549   : > { %v2592_v58 = vpop.eup %2591 }
 0x54a   : > { %v1778_v59 = vmul.f32 %v2592_v58, %v1768_v44 }
 0x54c   : > { %v1786_v6 = vrot.slane %v1778_v59, %v1785_v55 }
 0x54e   : > { %v1787_v7 = vcombine.high %v1786_v6, %v1786_v6  ;;  %v1794_v2 = vrot.slane %v1786_v6, %v1785_v55 }
 0x550   : > { %v1801_v5 = vrot.slane %v1787_v7, %v1785_v55  ;;  %1805 = vst.msk [vmem:[%s357_s14] sm:$0x1] %vm1804_vm4, %v1794_v2 }
 0x552   : > { %1806 = vst.msk [vmem:[%s357_s14 + $0x1] sm:$0x1] %vm1804_vm4, %v1801_v5 }
 0x553   : > { %2632 = shalt.err (!%p2629_p7)
}
 0x554   : > { %s2633_s23 = scalar_lea.hbm %s3171_s21, 32  ;;  %s2637_s16 = scalar_lea.hbm %s3224_s9, 128 }
 0x555   : > { %p2634_p8 = scmp.ne.s32.totalorder %s3171_s21, %s2633_s23  ;;  %p2638_p11 = scmp.lt.s32.totalorder %s3171_s21, %s3224_s9 }
 0x556   : > { %p2639_p12 = scmp.lt.s32.totalorder %s2637_s16, %s2633_s23 }
 0x557   : > { %p2635_p9 = pnand %p2634_p8, %p2782_p5 }
 0x558   : > { %p2640_p13 = por %p2639_p12, %p2638_p11 }
 0x559   : > { %p2636_p10 = pneg %p2635_p9 }
 0x55b   : > { %p2641_p0 = pnand %p2640_p13, %p2636_p10 }
 0x55d   : > { %2644 = shalt.err (!%p2641_p0)
}
 0x55e   : > { %s2692_s13 = smov 16   ;;  %s2693_s28 = smov 1  }
 0x55f   : > { %2531 = dma.vmem_to_hbm [thread:$0]  (%p2782_p5), %s3173_s17, 32, %s3171_s21, %s1813_s26, %s2692_s13, %s2692_s13, %s2693_s28  }
 0x560 PF: > { %p2541_p1 = scmp.ge.s32.totalorder %s2683_s12, 2  ;;  %s1857_s27 = sand.u32 1, %s2671_s30  }
 0x561   : > { %s1858_s23 = scalar_lea.sflag [#allocation3], %s1857_s27 }
 0x562   : > { %p2535_p2 = pnand %p2541_p1, %p2786_p6 }
 0x564   : > { %p2536_p3 = pneg %p2535_p2 }
 0x566   : > { %2662 = dma.done.wait (%p2536_p3), %s1858_s23, 2048  }
 0x567   : > { %2664 = vsyncadd (%p2536_p3), %s1858_s23, 4294965248  ;;  %s1867_s29 = scalar_lea.sflag [#allocation5], %s1857_s27 }
 0x568   : > { %2666 = dma.done.wait (%p2536_p3), %s1867_s29, 32  }
 0x569   : > { %2668 = vsyncadd (%p2536_p3), %s1867_s29, 4294967264  ;;  %p23_p5 = scmp.ge.s32.totalorder %s2769_s15, 6   ;;  %s3228_s30 = smov %s2675_s10 }
 0x56a   : > { %s3229_s10 = smov %s2679_s11  ;;  %s3230_s11 = smov %s2780_s18 }
 0x56b   : > { %s3231_s12 = smov %s2769_s15  ;;  %25 = sbr.rel (!%p23_p5) target bundleno = 5 (0x5), region = 107 }
 0x570   :  { %1872 = vsyncpa [#allocation3], 1 }
 0x571   :  { %1874 = vsyncpa [#allocation3 + $0x1], 1 }
 0x572   :  { %1875 = vsyncpa [#allocation5], 1 }
 0x573   :  { %1877 = vsyncpa [#allocation5 + $0x1], 1 }

</bundles_post_ra>
